<compile_context>
chip_gen: v5e
topology: v5e:2x2
jax: 0.10.0
libtpu: 0.0.40
codegen_flags: <defaults>
</compile_context>

<pallas_src>
import jax
import jax.numpy as jnp
from jax.experimental import pallas as pl
from jax.experimental.pallas import tpu as pltpu

# ---------------- problem sizes (small, consistent with the module) ----------------
N_NODES = 128      # number of graph nodes
NFEAT = 64         # input feature dim
NHID = 64          # hidden dim
NCLASS = 8         # number of classes
NCLASS_PAD = 128   # class dim zero-padded to a full lane width inside the kernel
N_GROUPS = min(32, NHID)          # GroupNorm groups (PyTorch: min(32, nhid))
GROUP_SIZE = NHID // N_GROUPS     # channels per group
GN_EPS = 1e-5                     # nn.GroupNorm default eps
NEG_INF = -1e30                   # mask value for the padded softmax lanes

assert GROUP_SIZE == 2, "pairwise GroupNorm below assumes min(32, nhid) -> groups of 2"


def _rgcn_kernel(x_ref, adj_ref,
                 w1_ref, b1_ref, g1_ref, be1_ref,
                 w2_ref, b2_ref, g2_ref, be2_ref,
                 w3_ref, b3_ref,
                 out_ref):
    f32 = jnp.float32
    bf16 = jnp.bfloat16

    # adj is reused by all three layers; cast to bf16 once (halves its footprint).
    adj = adj_ref[...].astype(bf16)

    # Lane-parity mask, hoisted once: channel c's GroupNorm partner is c ^ 1.
    lane = jax.lax.broadcasted_iota(jnp.int32, (N_NODES, NHID), 1)
    is_even = (lane % 2) == 0

    def graph_conv(h, w_ref, b_ref):
        # adj @ (h @ W) + b, bf16 operands / f32 accumulation on the MXU.
        s = jnp.dot(h.astype(bf16), w_ref[...].astype(bf16),
                    preferred_element_type=f32)
        return jnp.dot(adj, s.astype(bf16), preferred_element_type=f32) + b_ref[...]

    def group_norm(h, gamma, beta):
        # Pairwise GroupNorm (group size 2): partner = h[:, c ^ 1] via XLU rolls.
        left = pltpu.roll(h, shift=NHID - 1, axis=1)    # out[c] = h[(c + 1) % NHID]
        right = pltpu.roll(h, shift=1, axis=1)          # out[c] = h[(c - 1) % NHID]
        partner = jnp.where(is_even, left, right)
        d = 0.5 * (h - partner)                         # = h - group_mean
        xhat = d * jax.lax.rsqrt(d * d + GN_EPS)        # var = d*d >= 0 by construction
        return xhat * gamma + beta

    # ---- gc1 + relu + norm1 ----
    h1 = group_norm(jnp.maximum(graph_conv(x_ref[...], w1_ref, b1_ref), 0.0),
                    g1_ref[...], be1_ref[...])

    # ---- gc2 + relu + norm2 + residual ----
    h2 = group_norm(jnp.maximum(graph_conv(h1, w2_ref, b2_ref), 0.0),
                    g2_ref[...], be2_ref[...])
    h = h2 + h1

    # ---- gc3 (class dim zero-padded to 128 lanes) ----
    z = graph_conv(h, w3_ref, b3_ref)                   # (N, NCLASS_PAD)

    # ---- masked log_softmax over the first NCLASS lanes (dim=1) ----
    cls = jax.lax.broadcasted_iota(jnp.int32, (N_NODES, NCLASS_PAD), 1)
    valid = cls < NCLASS
    zm = jnp.where(valid, z, NEG_INF)
    m = jnp.max(zm, axis=-1, keepdims=True)
    e = jnp.where(valid, jnp.exp(zm - m), 0.0)
    lse = jnp.log(jnp.sum(e, axis=-1, keepdims=True)) + m
    out_ref[...] = z - lse        # padded columns are sliced away in the wrapper


def rgcn3fullnorm_forward(x, adj, params):
    n = x.shape[0]
    ins = (x, adj,
           params["w1"], params["b1"], params["gamma1"], params["beta1"],
           params["w2"], params["b2"], params["gamma2"], params["beta2"],
           params["w3_pad"], params["b3_pad"])
    vmem = pl.BlockSpec(memory_space=pltpu.MemorySpace.VMEM)
    out_pad = pl.pallas_call(
        _rgcn_kernel,
        out_shape=jax.ShapeDtypeStruct((n, NCLASS_PAD), jnp.float32),
        in_specs=[vmem] * len(ins),
        out_specs=vmem,
    )(*ins)
    return out_pad[:, :NCLASS]


def rgcn3fullnorm_reference(x, adj, params):
    """Pure-JAX reference using the same bf16-matmul / f32-accumulation recipe."""
    bf16, f32 = jnp.bfloat16, jnp.float32
    adj_bf = adj.astype(bf16)

    def gconv(h, w, b):
        s = jnp.dot(h.astype(bf16), w.astype(bf16), preferred_element_type=f32)
        return jnp.dot(adj_bf, s.astype(bf16), preferred_element_type=f32) + b

    def gnorm(h, gamma, beta):
        hg = h.reshape(h.shape[0], N_GROUPS, GROUP_SIZE)
        mean = jnp.mean(hg, axis=-1, keepdims=True)
        var = jnp.mean((hg - mean) ** 2, axis=-1, keepdims=True)
        xhat = ((hg - mean) * jax.lax.rsqrt(var + GN_EPS)).reshape(h.shape)
        return xhat * gamma + beta

    h1 = gnorm(jnp.maximum(gconv(x, params["w1"], params["b1"]), 0.0),
               params["gamma1"], params["beta1"])
    h2 = gnorm(jnp.maximum(gconv(h1, params["w2"], params["b2"]), 0.0),
               params["gamma2"], params["beta2"])
    h = h2 + h1
    z = gconv(h, params["w3_pad"], params["b3_pad"])[:, :NCLASS]
    return jax.nn.log_softmax(z, axis=-1)


def make_params(key):
    ks = jax.random.split(key, 10)
    f32 = jnp.float32

    def unif(k, shape, scale):
        return jax.random.uniform(k, shape, dtype=f32, minval=-scale, maxval=scale)

    # GraphConvolution init: uniform(-1/sqrt(out_features), 1/sqrt(out_features)).
    w1 = unif(ks[0], (NFEAT, NHID), 1.0 / jnp.sqrt(NHID))
    b1 = unif(ks[1], (1, NHID), 1.0 / jnp.sqrt(NHID))
    w2 = unif(ks[2], (NHID, NHID), 1.0 / jnp.sqrt(NHID))
    b2 = unif(ks[3], (1, NHID), 1.0 / jnp.sqrt(NHID))
    w3 = unif(ks[4], (NHID, NCLASS), 1.0 / jnp.sqrt(NCLASS))
    b3 = unif(ks[5], (1, NCLASS), 1.0 / jnp.sqrt(NCLASS))

    # Zero-pad the class dimension to a full 128-lane width so gc3 / log-softmax /
    # the final store are lane-dense.  Padded columns are exactly zero and get
    # sliced off by the wrapper.
    w3_pad = jnp.zeros((NHID, NCLASS_PAD), f32).at[:, :NCLASS].set(w3)
    b3_pad = jnp.zeros((1, NCLASS_PAD), f32).at[:, :NCLASS].set(b3)

    # GroupNorm affine params (PyTorch default is ones/zeros; perturbed so the
    # affine transform is exercised, but still deterministic).
    gamma1 = 1.0 + 0.1 * jax.random.normal(ks[6], (1, NHID), dtype=f32)
    beta1 = 0.1 * jax.random.normal(ks[7], (1, NHID), dtype=f32)
    gamma2 = 1.0 + 0.1 * jax.random.normal(ks[8], (1, NHID), dtype=f32)
    beta2 = 0.1 * jax.random.normal(ks[9], (1, NHID), dtype=f32)

    return dict(w1=w1, b1=b1, gamma1=gamma1, beta1=beta1,
                w2=w2, b2=b2, gamma2=gamma2, beta2=beta2,
                w3_pad=w3_pad, b3_pad=b3_pad)


if __name__ == "__main__":
    key = jax.random.PRNGKey(0)
    k_x, k_adj, k_p = jax.random.split(key, 3)

    # Node features.
    x = jax.random.normal(k_x, (N_NODES, NFEAT), dtype=jnp.float32)

    # Dense, row-normalized adjacency with self loops (typical GCN preprocessing).
    a = (jax.random.uniform(k_adj, (N_NODES, N_NODES)) < 0.05).astype(jnp.float32)
    a = jnp.maximum(a, a.T) + jnp.eye(N_NODES, dtype=jnp.float32)
    adj = a / jnp.sum(a, axis=1, keepdims=True)

    params = make_params(k_p)

    out = jax.block_until_ready(rgcn3fullnorm_forward(x, adj, params))

    assert out.shape == (N_NODES, NCLASS)
    assert bool(jnp.all(jnp.isfinite(out)))
    # log_softmax rows must normalize to 1 in probability space.
    assert bool(jnp.allclose(jnp.sum(jnp.exp(out), axis=1), 1.0, atol=1e-4))
    # Kernel vs. pure-JAX reference (same bf16-matmul recipe); generous tolerance
    # covers EUP exp/log/rsqrt approximation differences.
    ref = rgcn3fullnorm_reference(x, adj, params)
    assert bool(jnp.allclose(out, ref, atol=3e-2, rtol=3e-2))
    print("KERNEL_OK")
</pallas_src>

<mosaic_0001>
module attributes {stable_mosaic.version = 11 : i64} {
  func.func @_rgcn_kernel(%arg0: memref<128x64xf32, #tpu.memory_space<vmem>>, %arg1: memref<128x128xf32, #tpu.memory_space<vmem>>, %arg2: memref<64x64xf32, #tpu.memory_space<vmem>>, %arg3: memref<1x64xf32, #tpu.memory_space<vmem>>, %arg4: memref<1x64xf32, #tpu.memory_space<vmem>>, %arg5: memref<1x64xf32, #tpu.memory_space<vmem>>, %arg6: memref<64x64xf32, #tpu.memory_space<vmem>>, %arg7: memref<1x64xf32, #tpu.memory_space<vmem>>, %arg8: memref<1x64xf32, #tpu.memory_space<vmem>>, %arg9: memref<1x64xf32, #tpu.memory_space<vmem>>, %arg10: memref<64x128xf32, #tpu.memory_space<vmem>>, %arg11: memref<1x128xf32, #tpu.memory_space<vmem>>, %arg12: memref<128x128xf32, #tpu.memory_space<vmem>>) attributes {dimension_semantics = [], scalar_prefetch = 0 : i64, scratch_operands = 0 : i64, tpu.core_type = #tpu.core_type<tc>} {
    %c0 = arith.constant 0 : index
    %c0_0 = arith.constant 0 : index
    %0 = vector.load %arg1[%c0, %c0_0] : memref<128x128xf32, #tpu.memory_space<vmem>>, vector<128x128xf32>
    %1 = arith.truncf %0 : vector<128x128xf32> to vector<128x128xbf16>
    %2 = tpu.iota {dimensions = array<i32: 1>} : vector<128x64xi32>
    %c2_i32 = arith.constant 2 : i32
    %c0_i32 = arith.constant 0 : i32
    %3 = arith.cmpi eq, %c2_i32, %c0_i32 : i32
    %c1_i32 = arith.constant 1 : i32
    %4 = arith.select %3, %c1_i32, %c2_i32 : i32
    %5 = vector.broadcast %4 : i32 to vector<128x64xi32>
    %6 = arith.remsi %2, %5 : vector<128x64xi32>
    %c0_i32_1 = arith.constant 0 : i32
    %7 = vector.broadcast %c0_i32_1 : i32 to vector<128x64xi32>
    %8 = arith.cmpi ne, %6, %7 : vector<128x64xi32>
    %c0_i32_2 = arith.constant 0 : i32
    %9 = vector.broadcast %c0_i32_2 : i32 to vector<128x64xi32>
    %10 = arith.cmpi slt, %6, %9 : vector<128x64xi32>
    %c0_i32_3 = arith.constant 0 : i32
    %11 = arith.cmpi slt, %4, %c0_i32_3 : i32
    %12 = vector.broadcast %11 : i1 to vector<128x64xi1>
    %13 = vector.broadcast %12 : vector<128x64xi1> to vector<128x64xi1>
    %14 = arith.xori %10, %13 : vector<128x64xi1>
    %15 = arith.andi %14, %8 : vector<128x64xi1>
    %16 = vector.broadcast %4 : i32 to vector<128x64xi32>
    %17 = arith.addi %6, %16 : vector<128x64xi32>
    %18 = arith.select %15, %17, %6 : vector<128x64xi1>, vector<128x64xi32>
    %c0_i32_4 = arith.constant 0 : i32
    %19 = vector.broadcast %c0_i32_4 : i32 to vector<128x64xi32>
    %20 = arith.cmpi eq, %18, %19 : vector<128x64xi32>
    %c0_5 = arith.constant 0 : index
    %c0_6 = arith.constant 0 : index
    %21 = vector.load %arg0[%c0_5, %c0_6] : memref<128x64xf32, #tpu.memory_space<vmem>>, vector<128x64xf32>
    %22 = arith.truncf %21 : vector<128x64xf32> to vector<128x64xbf16>
    %c0_7 = arith.constant 0 : index
    %c0_8 = arith.constant 0 : index
    %23 = vector.load %arg2[%c0_7, %c0_8] : memref<64x64xf32, #tpu.memory_space<vmem>>, vector<64x64xf32>
    %24 = arith.truncf %23 : vector<64x64xf32> to vector<64x64xbf16>
    %cst = arith.constant dense<0.000000e+00> : vector<128x64xf32>
    %25 = tpu.matmul %22, %24, %cst {dimension_numbers = #tpu.dot_dimension_numbers<[1], [0], [0], [1], [0, 0, 1, 1], [], []>} : vector<128x64xbf16>, vector<64x64xbf16>, vector<128x64xf32> -> vector<128x64xf32>
    %26 = arith.truncf %25 : vector<128x64xf32> to vector<128x64xbf16>
    %cst_9 = arith.constant dense<0.000000e+00> : vector<128x64xf32>
    %27 = tpu.matmul %1, %26, %cst_9 {dimension_numbers = #tpu.dot_dimension_numbers<[1], [0], [0], [1], [0, 0, 1, 1], [], []>} : vector<128x128xbf16>, vector<128x64xbf16>, vector<128x64xf32> -> vector<128x64xf32>
    %c0_10 = arith.constant 0 : index
    %c0_11 = arith.constant 0 : index
    %28 = vector.load %arg3[%c0_10, %c0_11] : memref<1x64xf32, #tpu.memory_space<vmem>>, vector<1x64xf32>
    %29 = vector.broadcast %28 : vector<1x64xf32> to vector<128x64xf32>
    %30 = arith.addf %27, %29 : vector<128x64xf32>
    %cst_12 = arith.constant 0.000000e+00 : f32
    %31 = vector.broadcast %cst_12 : f32 to vector<128x64xf32>
    %32 = arith.maximumf %30, %31 : vector<128x64xf32>
    %c0_13 = arith.constant 0 : index
    %c0_14 = arith.constant 0 : index
    %33 = vector.load %arg4[%c0_13, %c0_14] : memref<1x64xf32, #tpu.memory_space<vmem>>, vector<1x64xf32>
    %c0_15 = arith.constant 0 : index
    %c0_16 = arith.constant 0 : index
    %34 = vector.load %arg5[%c0_15, %c0_16] : memref<1x64xf32, #tpu.memory_space<vmem>>, vector<1x64xf32>
    %c63_i32 = arith.constant 63 : i32
    %35 = tpu.dynamic_rotate %32 by %c63_i32 dim 1 : vector<128x64xf32>, i32 -> vector<128x64xf32>
    %c1_i32_17 = arith.constant 1 : i32
    %36 = tpu.dynamic_rotate %32 by %c1_i32_17 dim 1 : vector<128x64xf32>, i32 -> vector<128x64xf32>
    %37 = arith.select %20, %35, %36 : vector<128x64xi1>, vector<128x64xf32>
    %38 = arith.subf %32, %37 : vector<128x64xf32>
    %cst_18 = arith.constant 5.000000e-01 : f32
    %39 = vector.broadcast %cst_18 : f32 to vector<128x64xf32>
    %40 = arith.mulf %39, %38 : vector<128x64xf32>
    %41 = arith.mulf %40, %40 : vector<128x64xf32>
    %cst_19 = arith.constant 9.99999974E-6 : f32
    %42 = vector.broadcast %cst_19 : f32 to vector<128x64xf32>
    %43 = arith.addf %41, %42 : vector<128x64xf32>
    %44 = math.rsqrt %43 : vector<128x64xf32>
    %45 = arith.mulf %40, %44 : vector<128x64xf32>
    %46 = vector.broadcast %33 : vector<1x64xf32> to vector<128x64xf32>
    %47 = arith.mulf %45, %46 : vector<128x64xf32>
    %48 = vector.broadcast %34 : vector<1x64xf32> to vector<128x64xf32>
    %49 = arith.addf %47, %48 : vector<128x64xf32>
    %50 = arith.truncf %49 : vector<128x64xf32> to vector<128x64xbf16>
    %c0_20 = arith.constant 0 : index
    %c0_21 = arith.constant 0 : index
    %51 = vector.load %arg6[%c0_20, %c0_21] : memref<64x64xf32, #tpu.memory_space<vmem>>, vector<64x64xf32>
    %52 = arith.truncf %51 : vector<64x64xf32> to vector<64x64xbf16>
    %cst_22 = arith.constant dense<0.000000e+00> : vector<128x64xf32>
    %53 = tpu.matmul %50, %52, %cst_22 {dimension_numbers = #tpu.dot_dimension_numbers<[1], [0], [0], [1], [0, 0, 1, 1], [], []>} : vector<128x64xbf16>, vector<64x64xbf16>, vector<128x64xf32> -> vector<128x64xf32>
    %54 = arith.truncf %53 : vector<128x64xf32> to vector<128x64xbf16>
    %cst_23 = arith.constant dense<0.000000e+00> : vector<128x64xf32>
    %55 = tpu.matmul %1, %54, %cst_23 {dimension_numbers = #tpu.dot_dimension_numbers<[1], [0], [0], [1], [0, 0, 1, 1], [], []>} : vector<128x128xbf16>, vector<128x64xbf16>, vector<128x64xf32> -> vector<128x64xf32>
    %c0_24 = arith.constant 0 : index
    %c0_25 = arith.constant 0 : index
    %56 = vector.load %arg7[%c0_24, %c0_25] : memref<1x64xf32, #tpu.memory_space<vmem>>, vector<1x64xf32>
    %57 = vector.broadcast %56 : vector<1x64xf32> to vector<128x64xf32>
    %58 = arith.addf %55, %57 : vector<128x64xf32>
    %cst_26 = arith.constant 0.000000e+00 : f32
    %59 = vector.broadcast %cst_26 : f32 to vector<128x64xf32>
    %60 = arith.maximumf %58, %59 : vector<128x64xf32>
    %c0_27 = arith.constant 0 : index
    %c0_28 = arith.constant 0 : index
    %61 = vector.load %arg8[%c0_27, %c0_28] : memref<1x64xf32, #tpu.memory_space<vmem>>, vector<1x64xf32>
    %c0_29 = arith.constant 0 : index
    %c0_30 = arith.constant 0 : index
    %62 = vector.load %arg9[%c0_29, %c0_30] : memref<1x64xf32, #tpu.memory_space<vmem>>, vector<1x64xf32>
    %c63_i32_31 = arith.constant 63 : i32
    %63 = tpu.dynamic_rotate %60 by %c63_i32_31 dim 1 : vector<128x64xf32>, i32 -> vector<128x64xf32>
    %c1_i32_32 = arith.constant 1 : i32
    %64 = tpu.dynamic_rotate %60 by %c1_i32_32 dim 1 : vector<128x64xf32>, i32 -> vector<128x64xf32>
    %65 = arith.select %20, %63, %64 : vector<128x64xi1>, vector<128x64xf32>
    %66 = arith.subf %60, %65 : vector<128x64xf32>
    %cst_33 = arith.constant 5.000000e-01 : f32
    %67 = vector.broadcast %cst_33 : f32 to vector<128x64xf32>
    %68 = arith.mulf %67, %66 : vector<128x64xf32>
    %69 = arith.mulf %68, %68 : vector<128x64xf32>
    %cst_34 = arith.constant 9.99999974E-6 : f32
    %70 = vector.broadcast %cst_34 : f32 to vector<128x64xf32>
    %71 = arith.addf %69, %70 : vector<128x64xf32>
    %72 = math.rsqrt %71 : vector<128x64xf32>
    %73 = arith.mulf %68, %72 : vector<128x64xf32>
    %74 = vector.broadcast %61 : vector<1x64xf32> to vector<128x64xf32>
    %75 = arith.mulf %73, %74 : vector<128x64xf32>
    %76 = vector.broadcast %62 : vector<1x64xf32> to vector<128x64xf32>
    %77 = arith.addf %75, %76 : vector<128x64xf32>
    %78 = arith.addf %77, %49 : vector<128x64xf32>
    %79 = arith.truncf %78 : vector<128x64xf32> to vector<128x64xbf16>
    %c0_35 = arith.constant 0 : index
    %c0_36 = arith.constant 0 : index
    %80 = vector.load %arg10[%c0_35, %c0_36] : memref<64x128xf32, #tpu.memory_space<vmem>>, vector<64x128xf32>
    %81 = arith.truncf %80 : vector<64x128xf32> to vector<64x128xbf16>
    %cst_37 = arith.constant dense<0.000000e+00> : vector<128x128xf32>
    %82 = tpu.matmul %79, %81, %cst_37 {dimension_numbers = #tpu.dot_dimension_numbers<[1], [0], [0], [1], [0, 0, 1, 1], [], []>} : vector<128x64xbf16>, vector<64x128xbf16>, vector<128x128xf32> -> vector<128x128xf32>
    %83 = arith.truncf %82 : vector<128x128xf32> to vector<128x128xbf16>
    %cst_38 = arith.constant dense<0.000000e+00> : vector<128x128xf32>
    %84 = tpu.matmul %1, %83, %cst_38 {dimension_numbers = #tpu.dot_dimension_numbers<[1], [0], [0], [1], [0, 0, 1, 1], [], []>} : vector<128x128xbf16>, vector<128x128xbf16>, vector<128x128xf32> -> vector<128x128xf32>
    %c0_39 = arith.constant 0 : index
    %c0_40 = arith.constant 0 : index
    %85 = vector.load %arg11[%c0_39, %c0_40] : memref<1x128xf32, #tpu.memory_space<vmem>>, vector<1x128xf32>
    %86 = vector.broadcast %85 : vector<1x128xf32> to vector<128x128xf32>
    %87 = arith.addf %84, %86 : vector<128x128xf32>
    %88 = tpu.iota {dimensions = array<i32: 1>} : vector<128x128xi32>
    %c8_i32 = arith.constant 8 : i32
    %89 = vector.broadcast %c8_i32 : i32 to vector<128x128xi32>
    %90 = arith.cmpi slt, %88, %89 : vector<128x128xi32>
    %cst_41 = arith.constant -1.000000e+30 : f32
    %91 = vector.broadcast %cst_41 : f32 to vector<128x128xf32>
    %92 = arith.select %90, %87, %91 : vector<128x128xi1>, vector<128x128xf32>
    %cst_42 = arith.constant dense<0xFF800000> : vector<128xf32>
    %93 = vector.multi_reduction <maximumf>, %92, %cst_42 [1] : vector<128x128xf32> to vector<128xf32>
    %94 = vector.shape_cast %93 : vector<128xf32> to vector<128x1xf32>
    %95 = vector.broadcast %94 : vector<128x1xf32> to vector<128x128xf32>
    %96 = arith.subf %92, %95 : vector<128x128xf32>
    %97 = math.exp %96 : vector<128x128xf32>
    %cst_43 = arith.constant 0.000000e+00 : f32
    %98 = vector.broadcast %cst_43 : f32 to vector<128x128xf32>
    %99 = arith.select %90, %97, %98 : vector<128x128xi1>, vector<128x128xf32>
    %cst_44 = arith.constant dense<0.000000e+00> : vector<128xf32>
    %100 = vector.multi_reduction <add>, %99, %cst_44 [1] : vector<128x128xf32> to vector<128xf32>
    %101 = vector.shape_cast %100 : vector<128xf32> to vector<128x1xf32>
    %102 = math.log %101 : vector<128x1xf32>
    %103 = arith.addf %102, %94 : vector<128x1xf32>
    %104 = vector.broadcast %103 : vector<128x1xf32> to vector<128x128xf32>
    %105 = arith.subf %87, %104 : vector<128x128xf32>
    %c0_45 = arith.constant 0 : index
    %c0_46 = arith.constant 0 : index
    %106 = vector.load %arg12[%c0_45, %c0_46] : memref<128x128xf32, #tpu.memory_space<vmem>>, vector<128x128xf32>
    tpu.vector_store %arg12[%c0_45, %c0_46], %105 {strides = array<i32>} : memref<128x128xf32, #tpu.memory_space<vmem>>, vector<128x128xf32>,
    return
  }
}

</mosaic_0001>

<bundles_post_ra>
// kernel: tpu_custom_call.1
= control target key start
LH: loop header
LB: loop body
LE: loop exit
PB: predicated region body
PF: predicated region fallthrough
CT: control target
= control target key end

     0   :  { %17 = vsyncpa [#allocation3], 0  ;;  %s3613_s0 = inlined_call_operand.vmem [shape: f32[128,64], index: 0, kind: input, shape index: {}]   ;;  %s3614_s1 = inlined_call_operand.vmem [shape: f32[128,128], index: 1, kind: input, shape index: {}]   ;;  %s3615_s2 = inlined_call_operand.vmem [shape: f32[64,64], index: 2, kind: input, shape index: {}]   ;;  %s3616_s3 = inlined_call_operand.vmem [shape: f32[1,64], index: 3, kind: input, shape index: {}]   ;;  %s3617_s4 = inlined_call_operand.vmem [shape: f32[1,64], index: 4, kind: input, shape index: {}]   ;;  %s3618_s5 = inlined_call_operand.hbm [shape: f32[1,64], index: 5, kind: input, shape index: {}]   ;;  %s3619_s6 = inlined_call_operand.hbm [shape: f32[64,64], index: 6, kind: input, shape index: {}]   ;;  %s3620_s7 = inlined_call_operand.vmem [shape: f32[1,64], index: 7, kind: input, shape index: {}]   ;;  %s3621_s8 = inlined_call_operand.vmem [shape: f32[1,64], index: 8, kind: input, shape index: {}]   ;;  %s3622_s9 = inlined_call_operand.vmem [shape: f32[1,64], index: 9, kind: input, shape index: {}]   ;;  %s3623_s10 = inlined_call_operand.hbm [shape: f32[64,128], index: 10, kind: input, shape index: {}]   ;;  %s3624_s11 = inlined_call_operand.vmem [shape: f32[1,128], index: 11, kind: input, shape index: {}]   ;;  %s3625_s12 = inlined_call_operand.hbm [shape: f32[128,128], index: 12, kind: output, shape index: {}]  }
   0x1   :  { %18 = vsyncpa [#allocation6], 0  ;;  %s45_s23 = sshll.u32 %s3619_s6, 4  ;;  %s46_s23 = int_to_ptr.hbm [resolvable:$true] %s45_s23 }
   0x2   :  { %19 = vsyncpa [#allocation4], 0  ;;  %s2190_s24 = smov [#allocation5]   ;;  %s35_s28 = sshll.u32 %s3618_s5, 4  ;;  %s36_s28 = int_to_ptr.hbm [resolvable:$true] %s35_s28 }
   0x3   :  { %s47_s25 = sshll.u32 %s2190_s24, 4  ;;  %s2191_s29 = smov 128   ;;  %s48_s25 = int_to_ptr.vmem [resolvable:$true] %s47_s25 }
   0x4   :  { %s2192_s30 = smov 8   ;;  %s2193_s13 = smov [#allocation2]  }
   0x5   :  { %53 = dma.hbm_to_vmem [thread:$0]  %s46_s23, 1024, %s48_s25, [#allocation6], %s2191_s29, %s2191_s29, %s2192_s30  }
   0x6   :  { %s37_s14 = sshll.u32 %s2193_s13, 4  ;;  %s64_s16 = sshll.u32 %s3623_s10, 4  ;;  %s38_s14 = int_to_ptr.vmem [resolvable:$true] %s37_s14  ;;  %s65_s16 = int_to_ptr.hbm [resolvable:$true] %s64_s16 }
   0x7   :  { %40 = dma.hbm_to_vmem [thread:$0]  %s36_s28, 16, %s38_s14, [#allocation3]  }
   0x8   :  { %s2194_s17 = smov [#allocation7]  }
   0x9   :  { %s66_s18 = sshll.u32 %s2194_s17, 4  ;;  %s67_s18 = int_to_ptr.vmem [resolvable:$true] %s66_s18 }
   0xa   :  { %72 = dma.hbm_to_vmem [thread:$0]  %s65_s16, 1024, %s67_s18, [#allocation6], %s2191_s29, %s2191_s29, %s2192_s30  }
   0xb   :  { %2184 = dma.done.wait [#allocation3], 16  }
   0xc   :  { %2185 = vsyncadd [#allocation3], 4294967280 }
   0xd   :  { %2186 = dma.done.wait [#allocation6], 2048  }
   0xe   :  { %2187 = vsyncadd [#allocation6], 4294965248  ;;  %v157_v0 = vld [vmem:[%s3615_s2 + $0x30] sm:$0xff]  ;;  %v158_v1 = vld [vmem:[%s3615_s2 + $0x38] sm:$0xff]  ;;  %vm163_vm0 = vcmask 523264   ;;  %s2195_s19 = smov 64  }
   0xf   :  { %v155_v2 = vld [vmem:[%s3615_s2 + $0x20] sm:$0xff]  ;;  %v162_v3 = vpack.c.bf16 %v158_v1, %v157_v0  ;;  %v156_v4 = vld [vmem:[%s3615_s2 + $0x28] sm:$0xff]  ;;  %v153_v6 = vld [vmem:[%s3615_s2 + $0x10] sm:$0xff]  ;;  %vm316_vm1 = vcmask 1048064   ;;  %s1894_s26 = sshll.u32 %s3625_s12, 4  ;;  %s1895_s26 = int_to_ptr.hbm [resolvable:$true] %s1894_s26 }
  0x10   :  { %v161_v5 = vpack.c.bf16 %v156_v4, %v155_v2  ;;  %v154_v7 = vld [vmem:[%s3615_s2 + $0x18] sm:$0xff]  ;;  %v151_v9 = vld [vmem:[%s3615_s2] sm:$0xff]  ;;  %v152_v10 = vld [vmem:[%s3615_s2 + $0x8] sm:$0xff] }
  0x11   :  { %192 = vmatpush.bf16.msra.mxu0 %v162_v3  ;;  %1932 = vmatpush.bf16.msra.mxu1 %v162_v3  ;;  %v160_v8 = vpack.c.bf16 %v154_v7, %v153_v6  ;;  %v127_v11 = vld [vmem:[%s3613_s0] sm:$0xff]  ;;  %v159_v12 = vpack.c.bf16 %v152_v10, %v151_v9  ;;  %v128_v13 = vld [vmem:[%s3613_s0 + $0x8] sm:$0xff]  ;;  %v137_v14 = vld [vmem:[%s3613_s0 + $0x50] sm:$0xff] }
  0x12   :  { %v138_v15 = vld [vmem:[%s3613_s0 + $0x58] sm:$0xff]  ;;  %v143_v16 = vpack.c.bf16 %v128_v13, %v127_v11  ;;  %v129_v18 = vld [vmem:[%s3613_s0 + $0x10] sm:$0xff]  ;;  %v139_v20 = vld [vmem:[%s3613_s0 + $0x60] sm:$0xff] }
  0x13   :  { %v148_v17 = vpack.c.bf16 %v138_v15, %v137_v14  ;;  %v130_v19 = vld [vmem:[%s3613_s0 + $0x18] sm:$0xff]  ;;  %v140_v21 = vld [vmem:[%s3613_s0 + $0x68] sm:$0xff]  ;;  %v131_v24 = vld [vmem:[%s3613_s0 + $0x20] sm:$0xff] }
  0x14   :  { %v144_v22 = vpack.c.bf16 %v130_v19, %v129_v18  ;;  %v149_v23 = vpack.c.bf16 %v140_v21, %v139_v20  ;;  %v132_v25 = vld [vmem:[%s3613_s0 + $0x28] sm:$0xff]  ;;  %v141_v26 = vld [vmem:[%s3613_s0 + $0x70] sm:$0xff]  ;;  %v142_v27 = vld [vmem:[%s3613_s0 + $0x78] sm:$0xff] }
  0x15   :  { %193 = vmatpush.bf16.msra.mxu0 %v161_v5  ;;  %1933 = vmatpush.bf16.msra.mxu1 %v161_v5  ;;  %v145_v28 = vpack.c.bf16 %v132_v25, %v131_v24  ;;  %v150_v29 = vpack.c.bf16 %v142_v27, %v141_v26  ;;  %v133_v30 = vld [vmem:[%s3613_s0 + $0x30] sm:$0xff]  ;;  %v134_v31 = vld [vmem:[%s3613_s0 + $0x38] sm:$0xff]  ;;  %v135_v33 = vld [vmem:[%s3613_s0 + $0x40] sm:$0xff] }
  0x16   :  { %v146_v32 = vpack.c.bf16 %v134_v31, %v133_v30  ;;  %v136_v34 = vld [vmem:[%s3613_s0 + $0x48] sm:$0xff]  ;;  %v88_v60 = vld [vmem:[%s3614_s1] sm:$0xff]  ;;  %v90_v63 = vld [vmem:[%s3614_s1 + $0x10] sm:$0xff] }
  0x17   :  { %v147_v35 = vpack.c.bf16 %v136_v34, %v135_v33  ;;  %v89_v61 = vld [vmem:[%s3614_s1 + $0x8] sm:$0xff]  ;;  %v91_v0 = vld [vmem:[%s3614_s1 + $0x18] sm:$0xff]  ;;  %v92_v2 = vld [vmem:[%s3614_s1 + $0x20] sm:$0xff] }
  0x18   :  { %v2365_v62 = vpack.c.bf16 %v89_v61, %v88_v60  ;;  %v2374_v1 = vpack.c.bf16 %v91_v0, %v90_v63  ;;  %v93_v3 = vld [vmem:[%s3614_s1 + $0x28] sm:$0xff]  ;;  %v94_v5 = vld [vmem:[%s3614_s1 + $0x30] sm:$0xff]  ;;  %v95_v6 = vld [vmem:[%s3614_s1 + $0x38] sm:$0xff] }
  0x19   :  { %194 = vmatpush.bf16.msra.mxu0 %v160_v8  ;;  %1934 = vmatpush.bf16.msra.mxu1 %v160_v8  ;;  %v2383_v4 = vpack.c.bf16 %v93_v3, %v92_v2  ;;  %v2392_v7 = vpack.c.bf16 %v95_v6, %v94_v5  ;;  %v96_v8 = vld [vmem:[%s3614_s1 + $0x40] sm:$0xff]  ;;  %v97_v9 = vld [vmem:[%s3614_s1 + $0x48] sm:$0xff]  ;;  %v98_v11 = vld [vmem:[%s3614_s1 + $0x50] sm:$0xff] }
  0x1a   :  { %v2401_v10 = vpack.c.bf16 %v97_v9, %v96_v8  ;;  %v100_v14 = vld [vmem:[%s3614_s1 + $0x60] sm:$0xff]  ;;  %v101_v15 = vld [vmem:[%s3614_s1 + $0x68] sm:$0xff]  ;;  %v103_v18 = vld [vmem:[%s3614_s1 + $0x78] sm:$0xff] }
  0x1b   :  { %v2434_v20 = vld [vmem:[%s3616_s3] ss:$0 sm:$0xff]  ;;  %s2197_s3 = smov 127  }
  0x1d   :  { %195 = vmatpush.bf16.msra.mxu0 %v159_v12  ;;  %1935 = vmatpush.bf16.msra.mxu1 %v159_v12  ;;  %v99_v12 = vld [vmem:[%s3614_s1 + $0x58] sm:$0xff] }
  0x1e   :  { %v2410_v13 = vpack.c.bf16 %v99_v12, %v98_v11 }
  0x20   :  { %1908 = vmatmul.msk.bf16.vlgmr.msra.gmra.mxu0 %vm163_vm0, %v143_v16  ;;  %1913 = vmatmul.msk.bf16.vlgmr.msra.gmra.mxu1 %vm163_vm0, %v148_v17  ;;  %v2419_v16 = vpack.c.bf16 %v101_v15, %v100_v14  ;;  %v102_v17 = vld [vmem:[%s3614_s1 + $0x70] sm:$0xff]  ;;  %s2196_s1 = smov 65  }
  0x21   :  { %v2428_v19 = vpack.c.bf16 %v103_v18, %v102_v17 }
  0x30   :  { %1909 = vmatmul.msk.bf16.gmra.mxu0 %vm163_vm0, %v144_v22  ;;  %1914 = vmatmul.msk.bf16.gmra.mxu1 %vm163_vm0, %v149_v23 }
  0x40   :  { %1910 = vmatmul.msk.bf16.gmra.mxu0 %vm163_vm0, %v145_v28  ;;  %1915 = vmatmul.msk.bf16.gmra.mxu1 %vm163_vm0, %v150_v29 }
  0x50   :  { %1911 = vmatmul.msk.bf16.gmra.mxu0 %vm163_vm0, %v146_v32 }
  0x60   :  { %1912 = vmatmul.msk.bf16.gmra.mxu0 %vm163_vm0, %v147_v35 }
  0x9d   :  { %v197_v36 = vpop.f32.mrf.mxu0  ;;  %v222_v37 = vpop.f32.mrf.mxu1 }
  0xa5   :  { %v199_v38 = vpop.f32.mrf.mxu0  ;;  %v224_v39 = vpop.f32.mrf.mxu1 }
  0xa6   :  { %v237_v40 = vpack.c.bf16 %v199_v38, %v197_v36  ;;  %v242_v52 = vpack.c.bf16 %v224_v39, %v222_v37 }
  0xad   :  { %v202_v41 = vpop.f32.mrf.mxu0  ;;  %v227_v42 = vpop.f32.mrf.mxu1 }
  0xb5   :  { %v204_v43 = vpop.f32.mrf.mxu0  ;;  %v229_v44 = vpop.f32.mrf.mxu1 }
  0xb6   :  { %v243_v50 = vpack.c.bf16 %v229_v44, %v227_v42  ;;  %v238_v59 = vpack.c.bf16 %v204_v43, %v202_v41 }
  0xbd   :  { %v207_v45 = vpop.f32.mrf.mxu0  ;;  %v232_v46 = vpop.f32.mrf.mxu1 }
  0xc5   :  { %v209_v47 = vpop.f32.mrf.mxu0  ;;  %v234_v48 = vpop.f32.mrf.mxu1 }
  0xc6   :  { %v244_v49 = vpack.c.bf16 %v234_v48, %v232_v46  ;;  %v239_v58 = vpack.c.bf16 %v209_v47, %v207_v45 }
  0xc8   :  { %249 = vmatpush.bf16.msrb.mxu1 %v244_v49 }
  0xcc   :  { %250 = vmatpush.bf16.msrb.mxu1 %v243_v50 }
  0xcd   :  { %v212_v51 = vpop.f32.mrf.mxu0 }
  0xd0   :  { %251 = vmatpush.bf16.msrb.mxu1 %v242_v52 }
  0xd5   :  { %v214_v53 = vpop.f32.mrf.mxu0 }
  0xd6   :  { %v240_v57 = vpack.c.bf16 %v214_v53, %v212_v51 }
  0xdd   :  { %v217_v54 = vpop.f32.mrf.mxu0 }
  0xe5   :  { %v219_v55 = vpop.f32.mrf.mxu0 }
  0xe6   :  { %v241_v56 = vpack.c.bf16 %v219_v55, %v217_v54 }
  0xe8   :  { %252 = vmatpush.bf16.msrb.mxu1 %v241_v56 }
  0xec   :  { %253 = vmatpush.bf16.msrb.mxu1 %v240_v57 }
  0xf0   :  { %254 = vmatpush.bf16.msrb.mxu1 %v239_v58 }
  0xf4   :  { %255 = vmatpush.bf16.msrb.mxu1 %v238_v59 }
  0xf8   :  { %256 = vmatpush.bf16.msrb.mxu1 %v237_v40 }
  0xfb   :  { %257 = vmatmul.bf16.vlgmr.msrb.gmra.mxu1 %v2365_v62 }
 0x10b   :  { %262 = vmatmul.bf16.gmra.mxu1 %v2374_v1 }
 0x11b   :  { %267 = vmatmul.bf16.gmra.mxu1 %v2383_v4 }
 0x12b   :  { %272 = vmatmul.bf16.gmra.mxu1 %v2392_v7 }
 0x13b   :  { %277 = vmatmul.bf16.gmra.mxu1 %v2401_v10 }
 0x14b   :  { %282 = vmatmul.bf16.gmra.mxu1 %v2410_v13 }
 0x15b   :  { %287 = vmatmul.bf16.gmra.mxu1 %v2419_v16 }
 0x16b   :  { %292 = vmatmul.bf16.gmra.mxu1 %v2428_v19 }
 0x178   :  { %v258_v21 = vpop.f32.mrf.mxu1 }
 0x179   :  { %v259_v22 = vadd.f32 %v2434_v20, %v258_v21 }
 0x17b   :  { %v2437_v23 = vmax.f32 %v259_v22, 0.0 }
 0x17d   :  { %317 = vrot.lane.b32.xlu1 %v2437_v23, %s2195_s19 }
 0x180   :  { %v260_v24 = vpop.f32.mrf.mxu1 }
 0x181   :  { %v261_v25 = vadd.f32 %v2434_v20, %v260_v24 }
 0x183   :  { %v2442_v26 = vmax.f32 %v261_v25, 0.0 }
 0x185   :  { %320 = vrot.lane.b32.xlu1 %v2442_v26, %s2195_s19 }
 0x188   :  { %v263_v27 = vpop.f32.mrf.mxu1 }
 0x189   :  { %v264_v28 = vadd.f32 %v2434_v20, %v263_v27 }
 0x18b   :  { %v2447_v29 = vmax.f32 %v264_v28, 0.0 }
 0x18d   :  { %323 = vrot.lane.b32.xlu0 %v2447_v29, %s2195_s19 }
 0x190   :  { %v265_v30 = vpop.f32.mrf.mxu1 }
 0x191   :  { %v266_v31 = vadd.f32 %v2434_v20, %v265_v30 }
 0x193   :  { %v2452_v32 = vmax.f32 %v266_v31, 0.0 }
 0x195   :  { %326 = vrot.lane.b32.xlu1 %v2452_v32, %s2195_s19 }
 0x198   :  { %v268_v33 = vpop.f32.mrf.mxu1 }
 0x199   :  { %v269_v34 = vadd.f32 %v2434_v20, %v268_v33 }
 0x19b   :  { %v2457_v35 = vmax.f32 %v269_v34, 0.0 }
 0x19d   :  { %329 = vrot.lane.b32.xlu0 %v2457_v35, %s2195_s19 }
 0x1a0   :  { %v270_v36 = vpop.f32.mrf.mxu1 }
 0x1a1   :  { %v271_v37 = vadd.f32 %v2434_v20, %v270_v36 }
 0x1a3   :  { %v2462_v38 = vmax.f32 %v271_v37, 0.0 }
 0x1a5   :  { %332 = vrot.lane.b32.xlu1 %v2462_v38, %s2195_s19 }
 0x1a8   :  { %v273_v39 = vpop.f32.mrf.mxu1 }
 0x1a9   :  { %v274_v40 = vadd.f32 %v2434_v20, %v273_v39 }
 0x1ab   :  { %v2467_v41 = vmax.f32 %v274_v40, 0.0 }
 0x1ad   :  { %335 = vrot.lane.b32.xlu2 %v2467_v41, %s2195_s19 }
 0x1b0   :  { %v275_v42 = vpop.f32.mrf.mxu1 }
 0x1b1   :  { %v276_v49 = vadd.f32 %v2434_v20, %v275_v42 }
 0x1b3   :  { %v2483_v52 = vmax.f32 %v276_v49, 0.0 }
 0x1b8   :  { %v278_v43 = vpop.f32.mrf.mxu1 }
 0x1b9   :  { %v279_v44 = vadd.f32 %v2434_v20, %v278_v43 }
 0x1bb   :  { %v2472_v45 = vmax.f32 %v279_v44, 0.0 }
 0x1bd   :  { %341 = vrot.lane.b32.xlu0 %v2472_v45, %s2195_s19 }
 0x1c0   :  { %v280_v46 = vpop.f32.mrf.mxu1 }
 0x1c1   :  { %v281_v47 = vadd.f32 %v2434_v20, %v280_v46 }
 0x1c3   :  { %v2477_v48 = vmax.f32 %v281_v47, 0.0 }
 0x1c5   :  { %344 = vrot.lane.b32.xlu0 %v2477_v48, %s2195_s19 }
 0x1c8   :  { %v283_v50 = vpop.f32.mrf.mxu1 }
 0x1c9   :  { %v284_v51 = vadd.f32 %v2434_v20, %v283_v50 }
 0x1cb   :  { %v2485_v53 = vmax.f32 %v284_v51, 0.0 }
 0x1cd   :  { %347 = vrot.lane.b32.xlu2 %v2485_v53, %s2195_s19  ;;  %338 = vrot.lane.b32.xlu0 %v2483_v52, %s2195_s19 }
 0x1d0   :  { %v285_v54 = vpop.f32.mrf.mxu1 }
 0x1d1   :  { %v286_v55 = vadd.f32 %v2434_v20, %v285_v54 }
 0x1d3   :  { %v2492_v56 = vmax.f32 %v286_v55, 0.0 }
 0x1d5   :  { %350 = vrot.lane.b32.xlu2 %v2492_v56, %s2195_s19 }
 0x1d8   :  { %v288_v57 = vpop.f32.mrf.mxu1 }
 0x1d9   :  { %v289_v58 = vadd.f32 %v2434_v20, %v288_v57 }
 0x1db   :  { %v2497_v59 = vmax.f32 %v289_v58, 0.0 }
 0x1dd   :  { %353 = vrot.lane.b32.xlu2 %v2497_v59, %s2195_s19 }
 0x1e0   :  { %v290_v60 = vpop.f32.mrf.mxu1 }
 0x1e1   :  { %v291_v61 = vadd.f32 %v2434_v20, %v290_v60 }
 0x1e3   :  { %v2502_v63 = vmax.f32 %v291_v61, 0.0 }
 0x1e5   :  { %356 = vrot.lane.b32.xlu0 %v2502_v63, %s2195_s19 }
 0x1e8   :  { %v293_v0 = vpop.f32.mrf.mxu1 }
 0x1e9   :  { %v294_v2 = vadd.f32 %v2434_v20, %v293_v0 }
 0x1eb   :  { %v2507_v3 = vmax.f32 %v294_v2, 0.0 }
 0x1ed   :  { %359 = vrot.lane.b32.xlu2 %v2507_v3, %s2195_s19 }
 0x1ef   :  { %v318_v5 = vpop.permute.xlu1 %317 }
 0x1f0   :  { %v295_v6 = vpop.f32.mrf.mxu1  ;;  %v319_v8 = vsel %vm316_vm1, %v318_v5, %v2437_v23 }
 0x1f1   :  { %v296_v9 = vadd.f32 %v2434_v20, %v295_v6  ;;  %365 = vrot.lane.b32.xlu1 %v319_v8, %s2195_s19 }
 0x1f3   :  { %v2515_v11 = vmax.f32 %v296_v9, 0.0 }
 0x1f5   :  { %362 = vrot.lane.b32.xlu0 %v2515_v11, %s2195_s19 }
 0x1f7   :  { %v321_v12 = vpop.permute.xlu1 %320 }
 0x1f8   :  { %v322_v14 = vsel %vm316_vm1, %v321_v12, %v2442_v26 }
 0x1f9   :  { %367 = vrot.lane.b32.xlu2 %v322_v14, %s2195_s19 }
 0x1ff   :  { %v324_v15 = vpop.permute.xlu0 %323 }
 0x200   :  { %v325_v17 = vsel %vm316_vm1, %v324_v15, %v2447_v29 }
 0x201   :  { %369 = vrot.lane.b32.xlu1 %v325_v17, %s2195_s19 }
 0x207   :  { %v327_v18 = vpop.permute.xlu1 %326  ;;  %v336_v24 = vpop.permute.xlu2 %335 }
 0x208   :  { %v328_v20 = vsel %vm316_vm1, %v327_v18, %v2452_v32  ;;  %v337_v27 = vsel %vm316_vm1, %v336_v24, %v2467_v41 }
 0x209   :  { %371 = vrot.lane.b32.xlu2 %v328_v20, %s2195_s19 }
 0x20f   :  { %v330_v21 = vpop.permute.xlu0 %329 }
 0x210   :  { %v331_v22 = vsel %vm316_vm1, %v330_v21, %v2457_v35 }
 0x211   :  { %373 = vrot.lane.b32.xlu0 %v331_v22, %s2195_s19 }
 0x217   :  { %v333_v25 = vpop.permute.xlu1 %332 }
 0x218   :  { %v334_v28 = vsel %vm316_vm1, %v333_v25, %v2462_v38  ;;  %v112_v25 = vlaneseq }
 0x219   :  { %377 = vrot.lane.b32.xlu0 %v337_v27, %s2195_s19  ;;  %375 = vrot.lane.b32.xlu1 %v334_v28, %s2195_s19 }
 0x227   :  { %v348_v30 = vpop.permute.xlu2 %347 }
 0x228   :  { %v349_v31 = vsel %vm316_vm1, %v348_v30, %v2485_v53 }
 0x229   :  { %385 = vrot.lane.b32.xlu0 %v349_v31, %s2195_s19  ;;  %v2601_v31 = vand.u32 127, %v112_v25 }
 0x22f   :  { %v351_v33 = vpop.permute.xlu2 %350  ;;  %v342_v34 = vpop.permute.xlu0 %341 }
 0x230   :  { %v343_v47 = vsel %vm316_vm1, %v342_v34, %v2472_v45  ;;  %v352_v49 = vsel %vm316_vm1, %v351_v33, %v2492_v56  ;;  %v118_v34 = vand.u32 1, %v2601_v31 }
 0x232   :  { %vm2609_vm2 = vcmp.eq.s32.totalorder %v118_v34, 0 }
 0x237   :  { %v354_v36 = vpop.permute.xlu2 %353  ;;  %v345_v37 = vpop.permute.xlu0 %344 }
 0x238   :  { %v355_v39 = vsel %vm316_vm1, %v354_v36, %v2497_v59  ;;  %v346_v40 = vsel %vm316_vm1, %v345_v37, %v2477_v48 }
 0x239   :  { %389 = vrot.lane.b32.xlu0 %v355_v39, %s2195_s19  ;;  %383 = vrot.lane.b32.xlu2 %v346_v40, %s2195_s19  ;;  %v833_v40 = vld [vmem:[#allocation5 + $0x30] sm:$0xff] }
 0x23f   :  { %v339_v42 = vpop.permute.xlu0 %338 }
 0x240   :  { %v340_v43 = vsel %vm316_vm1, %v339_v42, %v2483_v52  ;;  %v834_v42 = vld [vmem:[#allocation5 + $0x38] sm:$0xff] }
 0x241   :  { %379 = vrot.lane.b32.xlu1 %v340_v43, %s2195_s19 }
 0x247   :  { %v360_v44 = vpop.permute.xlu2 %359 }
 0x248   :  { %v361_v46 = vsel %vm316_vm1, %v360_v44, %v2507_v3 }
 0x249   :  { %393 = vrot.lane.b32.xlu2 %v361_v46, %s2195_s19  ;;  %381 = vrot.lane.b32.xlu1 %v343_v47, %s2195_s19  ;;  %v838_v46 = vpack.c.bf16 %v834_v42, %v833_v40 }
 0x24b   :  { %867 = vmatpush.bf16.msra.mxu2 %v838_v46  ;;  %1936 = vmatpush.bf16.msra.mxu3 %v838_v46 }
 0x251   :  { %387 = vrot.lane.b32.xlu1 %v352_v49, %s2195_s19 }
 0x253   :  { %v368_v60 = vpop.permute.xlu2 %367 }
 0x254   :  { %v398_v61 = vsel %vm316_vm1, %v368_v60, %v2442_v26 }
 0x257   :  { %v357_v50 = vpop.permute.xlu0 %356 }
 0x258   :  { %v358_v51 = vsel %vm316_vm1, %v357_v50, %v2502_v63  ;;  %v831_v50 = vld [vmem:[#allocation5 + $0x20] sm:$0xff] }
 0x259   :  { %391 = vrot.lane.b32.xlu1 %v358_v51, %s2195_s19  ;;  %v832_v51 = vld [vmem:[#allocation5 + $0x28] sm:$0xff] }
 0x263   :  { %v366_v54 = vpop.permute.xlu1 %365  ;;  %v372_v5 = vpop.permute.xlu2 %371 }
 0x264   :  { %v397_v55 = vsel %vm316_vm1, %v366_v54, %v2437_v23  ;;  %v400_v14 = vsel %vm316_vm1, %v372_v5, %v2452_v32 }
 0x265   :  { %477 = vrot.lane.b32.xlu2 %v397_v55, %s2196_s1  ;;  %429 = vrot.lane.b32.xlu1 %v397_v55, %s2197_s3 }
 0x267   :  { %v363_v57 = vpop.permute.xlu0 %362 }
 0x268   :  { %v364_v58 = vsel %vm316_vm1, %v363_v57, %v2515_v11  ;;  %v837_v57 = vpack.c.bf16 %v832_v51, %v831_v50 }
 0x269   :  { %395 = vrot.lane.b32.xlu0 %v364_v58, %s2195_s19 }
 0x26a   :  { %868 = vmatpush.bf16.msra.mxu2 %v837_v57  ;;  %1937 = vmatpush.bf16.msra.mxu3 %v837_v57 }
 0x26d   :  { %431 = vrot.lane.b32.xlu2 %v398_v61, %s2197_s3 }
 0x271   :  { %479 = vrot.lane.b32.xlu0 %v398_v61, %s2196_s1 }
 0x273   :  { %v370_v0 = vpop.permute.xlu1 %369 }
 0x274   :  { %v399_v2 = vsel %vm316_vm1, %v370_v0, %v2447_v29  ;;  %v829_v0 = vld [vmem:[#allocation5 + $0x10] sm:$0xff] }
 0x275   :  { %433 = vrot.lane.b32.xlu2 %v399_v2, %s2197_s3 }
 0x283   :  { %v374_v6 = vpop.permute.xlu0 %373 }
 0x284   :  { %v401_v60 = vsel %vm316_vm1, %v374_v6, %v2457_v35 }
 0x28b   :  { %v2578_v12 = vpop.permute.xlu0 %377  ;;  %v376_v18 = vpop.permute.xlu1 %375 }
 0x28c   :  { %v402_v28 = vsel %vm316_vm1, %v376_v18, %v2462_v38 }
 0x293   :  { %v384_v8 = vpop.permute.xlu2 %383 }
 0x294   :  { %v406_v9 = vsel %vm316_vm1, %v384_v8, %v2477_v48 }
 0x295   :  { %447 = vrot.lane.b32.xlu0 %v406_v9, %s2197_s3 }
 0x29b   :  { %v386_v15 = vpop.permute.xlu0 %385 }
 0x29c   :  { %v407_v17 = vsel %vm316_vm1, %v386_v15, %v2485_v53 }
 0x29d   :  { %435 = vrot.lane.b32.xlu0 %v400_v14, %s2197_s3 }
 0x2a3   :  { %v394_v33 = vpop.permute.xlu2 %393 }
 0x2a5   :  { %449 = vrot.lane.b32.xlu0 %v407_v17, %s2197_s3 }
 0x2ab   :  { %v390_v36 = vpop.permute.xlu0 %389 }
 0x2ac   :  { %v409_v58 = vsel %vm316_vm1, %v390_v36, %v2497_v59 }
 0x2ad   :  { %481 = vrot.lane.b32.xlu0 %v399_v2, %s2196_s1  ;;  %v830_v2 = vld [vmem:[#allocation5 + $0x18] sm:$0xff] }
 0x2ae   :  { %v836_v8 = vpack.c.bf16 %v830_v2, %v829_v0 }
 0x2b0   :  { %869 = vmatpush.bf16.msra.mxu2 %v836_v8  ;;  %1938 = vmatpush.bf16.msra.mxu3 %v836_v8 }
 0x2b3   :  { %v2587_v20 = vpop.permute.xlu1 %379 }
 0x2bb   :  { %v382_v21 = vpop.permute.xlu1 %381 }
 0x2bc   :  { %v405_v22 = vsel %vm316_vm1, %v382_v21, %v2472_v45 }
 0x2bd   :  { %493 = vrot.lane.b32.xlu1 %v405_v22, %s2196_s1  ;;  %445 = vrot.lane.b32.xlu2 %v405_v22, %s2197_s3  ;;  %v403_v22 = vsel %vm316_vm1, %v2578_v12, %v2467_v41  ;;  %v404_v12 = vsel %vm316_vm1, %v2587_v20, %v2483_v52  ;;  %v2648_v20 = vld [vmem:[%s3617_s4] ss:$0 sm:$0xff] }
 0x2bf   :  { %v478_v43 = vpop.permute.xlu2 %477 }
 0x2c3   :  { %v388_v24 = vpop.permute.xlu1 %387 }
 0x2c4   :  { %v408_v37 = vsel %vm316_vm1, %v388_v24, %v2492_v56 }
 0x2c5   :  { %483 = vrot.lane.b32.xlu1 %v400_v14, %s2196_s1  ;;  %495 = vrot.lane.b32.xlu2 %v406_v9, %s2196_s1  ;;  %v827_v9 = vld [vmem:[#allocation5] sm:$0xff]  ;;  %v828_v14 = vld [vmem:[#allocation5 + $0x8] sm:$0xff] }
 0x2c6   :  { %v835_v6 = vpack.c.bf16 %v828_v14, %v827_v9 }
 0x2c7   :  { %v432_v15 = vpop.permute.xlu2 %431 }
 0x2c8   :  { %870 = vmatpush.bf16.msra.mxu2 %v835_v6  ;;  %1939 = vmatpush.bf16.msra.mxu3 %v835_v6 }
 0x2cb   :  { %v392_v27 = vpop.permute.xlu1 %391 }
 0x2cc   :  { %v410_v30 = vsel %vm316_vm1, %v392_v27, %v2502_v63 }
 0x2cd   :  { %497 = vrot.lane.b32.xlu1 %v407_v17, %s2196_s1  ;;  %439 = vrot.lane.b32.xlu2 %v402_v28, %s2197_s3 }
 0x2ce   :  { %503 = vrot.lane.b32.xlu0 %v410_v30, %s2196_s1 }
 0x2cf   :  { %v434_v2 = vpop.permute.xlu2 %433 }
 0x2d5   :  { %499 = vrot.lane.b32.xlu2 %v408_v37, %s2196_s1  ;;  %451 = vrot.lane.b32.xlu1 %v408_v37, %s2197_s3 }
 0x2d6   :  { %487 = vrot.lane.b32.xlu0 %v402_v28, %s2196_s1 }
 0x2d7   :  { %v430_v44 = vpop.permute.xlu1 %429 }
 0x2d8   :  { %v525_v47 = vsel %vm2609_vm2, %v430_v44, %v478_v43 }
 0x2d9   :  { %v541_v49 = vsub.f32 %v2437_v23, %v525_v47  ;;  %v411_v23 = vsel %vm316_vm1, %v394_v33, %v2507_v3 }
 0x2db   :  { %v557_v54 = vmul.f32 0.5, %v541_v49  ;;  %v396_v55 = vpop.permute.xlu0 %395 }
 0x2dd   :  { %v573_v61 = vmul.f32 %v557_v54, %v557_v54  ;;  %501 = vrot.lane.b32.xlu2 %v409_v58, %s2196_s1  ;;  %437 = vrot.lane.b32.xlu1 %v401_v60, %s2197_s3 }
 0x2de   :  { %457 = vrot.lane.b32.xlu0 %v411_v23, %s2197_s3 }
 0x2df   :  { %v589_v5 = vadd.f32 1e-05, %v573_v61 }
 0x2e1   :  { %1960 = vrsqrt.f32 %v589_v5  ;;  %vm611_vm4 = vweird.f32 %v589_v5 }
 0x2e3   :  { %v480_v17 = vpop.permute.xlu0 %479 }
 0x2e4   :  { %v526_v18 = vsel %vm2609_vm2, %v432_v15, %v480_v17 }
 0x2e5   :  { %v542_v21 = vsub.f32 %v2442_v26, %v526_v18  ;;  %453 = vrot.lane.b32.xlu1 %v409_v58, %s2197_s3  ;;  %455 = vrot.lane.b32.xlu2 %v410_v30, %s2197_s3  ;;  %v412_v26 = vsel %vm316_vm1, %v396_v55, %v2515_v11  ;;  %v2653_v58 = vld [vmem:[#allocation2] ss:$0 sm:$0xff] }
 0x2e6   :  { %441 = vrot.lane.b32.xlu0 %v403_v22, %s2197_s3 }
 0x2e7   :  { %v1961_v24 = vpop.eup %1960  ;;  %v558_v25 = vmul.f32 0.5, %v542_v21 }
 0x2e8   :  { %v606_v27 = vmul.f32 %v1961_v24, %v589_v5  ;;  %vm612_vm3 = vweird.f32 %v1961_v24 }
 0x2e9   :  { %v574_v28 = vmul.f32 %v558_v25, %v558_v25  ;;  %vm613_vm5 = vmor %vm611_vm4, %vm612_vm3 }
 0x2ea   :  { %v607_v33 = vmul.f32 %v1961_v24, %v606_v27 }
 0x2eb   :  { %v590_v34 = vadd.f32 1e-05, %v574_v28 }
 0x2ec   :  { %v608_v36 = vmul.f32 0.5, %v607_v33 }
 0x2ed   :  { %1962 = vrsqrt.f32 %v590_v34  ;;  %459 = vrot.lane.b32.xlu1 %v412_v26, %s2197_s3  ;;  %485 = vrot.lane.b32.xlu2 %v401_v60, %s2196_s1  ;;  %vm621_vm7 = vweird.f32 %v590_v34 }
 0x2ee   :  { %491 = vrot.lane.b32.xlu0 %v404_v12, %s2196_s1  ;;  %v609_v30 = vsub.f32 1.5, %v608_v36 }
 0x2f0   :  { %v610_v40 = vmul.f32 %v1961_v24, %v609_v30 }
 0x2f2   :  { %v614_v44 = vsel %vm613_vm5, %v1961_v24, %v610_v40 }
 0x2f3   :  { %v1963_v37 = vpop.eup %1962  ;;  %v765_v49 = vmul.f32 %v614_v44, %v557_v54 }
 0x2f4   :  { %v616_v42 = vmul.f32 %v1963_v37, %v590_v34  ;;  %vm622_vm6 = vweird.f32 %v1963_v37 }
 0x2f5   :  { %505 = vrot.lane.b32.xlu1 %v411_v23, %s2196_s1  ;;  %507 = vrot.lane.b32.xlu2 %v412_v26, %s2196_s1  ;;  %vm623_vm8 = vmor %vm621_vm7, %vm622_vm6  ;;  %v784_v55 = vmul.f32 %v2648_v20, %v765_v49 }
 0x2f6   :  { %v617_v43 = vmul.f32 %v1963_v37, %v616_v42 }
 0x2f7   :  { %v2657_v61 = vadd.f32 %v2653_v58, %v784_v55 }
 0x2f8   :  { %v618_v46 = vmul.f32 0.5, %v617_v43 }
 0x2fa   :  { %v619_v47 = vsub.f32 1.5, %v618_v46 }
 0x2fc   :  { %v620_v50 = vmul.f32 %v1963_v37, %v619_v47 }
 0x2fd   :  { %443 = vrot.lane.b32.xlu1 %v404_v12, %s2197_s3  ;;  %489 = vrot.lane.b32.xlu2 %v403_v22, %s2196_s1 }
 0x2fe   :  { %v624_v51 = vsel %vm623_vm8, %v1963_v37, %v620_v50 }
 0x2ff   :  { %v766_v57 = vmul.f32 %v624_v51, %v558_v25 }
 0x301   :  { %v785_v60 = vmul.f32 %v2648_v20, %v766_v57 }
 0x303   :  { %v2660_v54 = vadd.f32 %v2653_v58, %v785_v60 }
 0x305   :  { %v819_v23 = vpack.c.bf16 %v2660_v54, %v2657_v61 }
 0x307   :  { %v448_v0 = vpop.permute.xlu0 %447  ;;  %1916 = vmatmul.msk.bf16.vlgmr.msra.gmra.mxu2 %vm163_vm0, %v819_v23 }
 0x30f   :  { %v436_v5 = vpop.permute.xlu0 %435 }
 0x317   :  { %v450_v8 = vpop.permute.xlu0 %449  ;;  %v446_v9 = vpop.permute.xlu2 %445 }
 0x31f   :  { %v482_v14 = vpop.permute.xlu0 %481  ;;  %v496_v6 = vpop.permute.xlu2 %495 }
 0x320   :  { %v527_v15 = vsel %vm2609_vm2, %v434_v2, %v482_v14  ;;  %v534_v17 = vsel %vm2609_vm2, %v448_v0, %v496_v6 }
 0x321   :  { %v543_v18 = vsub.f32 %v2447_v29, %v527_v15  ;;  %v550_v21 = vsub.f32 %v2477_v48, %v534_v17 }
 0x323   :  { %v2671_v22 = vmul.f32 0.5, %v543_v18  ;;  %v566_v24 = vmul.f32 0.5, %v550_v21 }
 0x325   :  { %v575_v25 = vmul.f32 %v2671_v22, %v2671_v22  ;;  %v582_v27 = vmul.f32 %v566_v24, %v566_v24 }
 0x327   :  { %v598_v28 = vadd.f32 1e-05, %v582_v27  ;;  %v2675_v33 = vpop.permute.xlu2 %439  ;;  %v591_v34 = vadd.f32 1e-05, %v575_v25 }
 0x329   :  { %1964 = vrsqrt.f32 %v598_v28  ;;  %vm701_vm10 = vweird.f32 %v598_v28  ;;  %vm631_vm14 = vweird.f32 %v591_v34 }
 0x32a   :  { %1966 = vrsqrt.f32 %v591_v34 }
 0x32f   :  { %v2677_v36 = vpop.permute.xlu2 %499  ;;  %v494_v26 = vpop.permute.xlu1 %493 }
 0x330   :  { %v1965_v12 = vpop.eup %1964  ;;  %v533_v29 = vsel %vm2609_vm2, %v446_v9, %v494_v26 }
 0x331   :  { %v696_v48 = vmul.f32 %v1965_v12, %v598_v28  ;;  %v549_v30 = vsub.f32 %v2472_v45, %v533_v29  ;;  %v2682_v37 = vpop.eup %1966  ;;  %vm702_vm9 = vweird.f32 %v1965_v12 }
 0x332   :  { %v626_v44 = vmul.f32 %v2682_v37, %v591_v34  ;;  %vm703_vm11 = vmor %vm701_vm10, %vm702_vm9  ;;  %vm632_vm12 = vweird.f32 %v2682_v37 }
 0x333   :  { %v565_v40 = vmul.f32 0.5, %v549_v30  ;;  %v697_v42 = vmul.f32 %v1965_v12, %v696_v48  ;;  %vm2714_vm15 = vmor %vm631_vm14, %vm632_vm12 }
 0x334   :  { %v627_v45 = vmul.f32 %v2682_v37, %v626_v44 }
 0x335   :  { %v581_v43 = vmul.f32 %v565_v40, %v565_v40  ;;  %v698_v50 = vmul.f32 0.5, %v697_v42 }
 0x336   :  { %v628_v0 = vmul.f32 0.5, %v627_v45 }
 0x337   :  { %v597_v46 = vadd.f32 1e-05, %v581_v43  ;;  %v2685_v47 = vpop.permute.xlu2 %501  ;;  %v484_v49 = vpop.permute.xlu1 %483  ;;  %v699_v60 = vsub.f32 1.5, %v698_v50 }
 0x338   :  { %v528_v51 = vsel %vm2609_vm2, %v436_v5, %v484_v49  ;;  %v629_v25 = vsub.f32 1.5, %v628_v0 }
 0x339   :  { %1968 = vrsqrt.f32 %v597_v46  ;;  %v544_v55 = vsub.f32 %v2452_v32, %v528_v51  ;;  %v700_v15 = vmul.f32 %v1965_v12, %v699_v60  ;;  %vm691_vm3 = vweird.f32 %v597_v46 }
 0x33a   :  { %v630_v43 = vmul.f32 %v2682_v37, %v629_v25 }
 0x33b   :  { %v2691_v57 = vmul.f32 0.5, %v544_v55  ;;  %v704_v48 = vsel %vm703_vm11, %v1965_v12, %v700_v15 }
 0x33c   :  { %v774_v44 = vmul.f32 %v704_v48, %v566_v24 }
 0x33d   :  { %v576_v23 = vmul.f32 %v2691_v57, %v2691_v57 }
 0x33f   :  { %v1969_v2 = vpop.eup %1968  ;;  %v2695_v9 = vadd.f32 1e-05, %v576_v23  ;;  %v456_v14 = vpop.permute.xlu2 %455 }
 0x340   :  { %v498_v6 = vpop.permute.xlu1 %497  ;;  %v686_v5 = vmul.f32 %v1969_v2, %v597_v46  ;;  %v504_v17 = vpop.permute.xlu0 %503  ;;  %vm692_vm13 = vweird.f32 %v1969_v2  ;;  %v634_v46 = vsel %vm2714_vm15, %v2682_v37, %v630_v43 }
 0x341   :  { %v535_v32 = vsel %vm2609_vm2, %v450_v8, %v498_v6  ;;  %1970 = vrsqrt.f32 %v2695_v9  ;;  %v538_v18 = vsel %vm2609_vm2, %v456_v14, %v504_v17  ;;  %vm693_vm4 = vmor %vm691_vm3, %vm692_vm13  ;;  %v793_v14 = vmul.f32 %v2648_v20, %v774_v44 }
 0x342   :  { %v551_v21 = vsub.f32 %v2485_v53, %v535_v32  ;;  %v687_v27 = vmul.f32 %v1969_v2, %v686_v5  ;;  %v554_v26 = vsub.f32 %v2502_v63, %v538_v18  ;;  %v767_v37 = vmul.f32 %v634_v46, %v2671_v22 }
 0x343   :  { %vm641_vm6 = vweird.f32 %v2695_v9 }
 0x344   :  { %v2704_v29 = vmul.f32 0.5, %v551_v21  ;;  %v688_v30 = vmul.f32 0.5, %v687_v27  ;;  %v2707_v8 = vmul.f32 0.5, %v554_v26  ;;  %v2754_v26 = vadd.f32 %v2653_v58, %v793_v14 }
 0x346   :  { %v583_v42 = vmul.f32 %v2704_v29, %v2704_v29  ;;  %v689_v53 = vsub.f32 1.5, %v688_v30  ;;  %v586_v60 = vmul.f32 %v2707_v8, %v2707_v8 }
 0x347   :  { %v1971_v28 = vpop.eup %1970  ;;  %v486_v49 = vpop.permute.xlu2 %485 }
 0x348   :  { %v2712_v63 = vadd.f32 1e-05, %v583_v42  ;;  %v452_v50 = vpop.permute.xlu1 %451  ;;  %v690_v51 = vmul.f32 %v1969_v2, %v689_v53  ;;  %v636_v55 = vmul.f32 %v1971_v28, %v2695_v9  ;;  %v488_v45 = vpop.permute.xlu0 %487  ;;  %v2735_v32 = vadd.f32 1e-05, %v586_v60 }
 0x349   :  { %v530_v24 = vsel %vm2609_vm2, %v2675_v33, %v488_v45  ;;  %v536_v34 = vsel %vm2609_vm2, %v452_v50, %v2677_v36  ;;  %vm642_vm5 = vweird.f32 %v1971_v28 }
 0x34a   :  { %1972 = vrsqrt.f32 %v2712_v63  ;;  %v694_v23 = vsel %vm693_vm4, %v1969_v2, %v690_v51  ;;  %v637_v0 = vmul.f32 %v1971_v28, %v636_v55  ;;  %v546_v15 = vsub.f32 %v2462_v38, %v530_v24  ;;  %vm643_vm7 = vmor %vm641_vm6, %vm642_vm5 }
 0x34b   :  { %v773_v6 = vmul.f32 %v694_v23, %v565_v40  ;;  %v552_v5 = vsub.f32 %v2492_v56, %v536_v34  ;;  %1974 = vrsqrt.f32 %v2735_v32  ;;  %v786_v51 = vmul.f32 %v2648_v20, %v767_v37 }
 0x34c   :  { %v638_v17 = vmul.f32 0.5, %v637_v0  ;;  %v2737_v18 = vmul.f32 0.5, %v546_v15  ;;  %vm711_vm9 = vweird.f32 %v2712_v63 }
 0x34d   :  { %v792_v33 = vmul.f32 %v2648_v20, %v773_v6  ;;  %v2739_v36 = vmul.f32 0.5, %v552_v5 }
 0x34e   :  { %v639_v2 = vsub.f32 1.5, %v638_v17  ;;  %v578_v38 = vmul.f32 %v2737_v18, %v2737_v18 }
 0x34f   :  { %v584_v56 = vmul.f32 %v2739_v36, %v2739_v36  ;;  %v2748_v40 = vpop.permute.xlu2 %507  ;;  %v2751_v27 = vadd.f32 %v2653_v58, %v792_v33 }
 0x350   :  { %v2742_v21 = vpop.eup %1972  ;;  %v438_v25 = vpop.permute.xlu1 %437  ;;  %v640_v22 = vmul.f32 %v1971_v28, %v639_v2  ;;  %v2764_v43 = vadd.f32 1e-05, %v578_v38 }
 0x351   :  { %v706_v48 = vmul.f32 %v2742_v21, %v2712_v63  ;;  %v2759_v30 = vpop.permute.xlu0 %457  ;;  %v529_v42 = vsel %vm2609_vm2, %v438_v25, %v486_v49  ;;  %v2766_v53 = vadd.f32 1e-05, %v584_v56  ;;  %v823_v12 = vpack.c.bf16 %v2754_v26, %v2751_v27  ;;  %v2782_v60 = vpop.eup %1974 }
 0x352   :  { %v644_v44 = vsel %vm643_vm7, %v1971_v28, %v640_v22  ;;  %v545_v9 = vsub.f32 %v2457_v35, %v529_v42  ;;  %1976 = vrsqrt.f32 %v2764_v43  ;;  %v736_v2 = vmul.f32 %v2782_v60, %v2735_v32 }
 0x353   :  { %v707_v50 = vmul.f32 %v2742_v21, %v706_v48  ;;  %v768_v55 = vmul.f32 %v644_v44, %v2691_v57  ;;  %1978 = vrsqrt.f32 %v2766_v53  ;;  %1920 = vmatmul.msk.bf16.vlgmr.msra.gmra.mxu3 %vm163_vm0, %v823_v12  ;;  %v2785_v57 = vadd.f32 %v2653_v58, %v786_v51 }
 0x354   :  { %v2776_v45 = vmul.f32 0.5, %v545_v9  ;;  %vm712_vm8 = vweird.f32 %v2742_v21  ;;  %v737_v42 = vmul.f32 %v2782_v60, %v736_v2  ;;  %vm661_vm11 = vweird.f32 %v2764_v43 }
 0x355   :  { %v708_v49 = vmul.f32 0.5, %v707_v50  ;;  %v787_v28 = vmul.f32 %v2648_v20, %v768_v55  ;;  %vm2813_vm10 = vmor %vm711_vm9, %vm712_vm8  ;;  %vm721_vm14 = vweird.f32 %v2766_v53  ;;  %vm742_vm6 = vweird.f32 %v2782_v60 }
 0x356   :  { %v577_v35 = vmul.f32 %v2776_v45, %v2776_v45  ;;  %vm741_vm8 = vweird.f32 %v2735_v32 }
 0x357   :  { %v709_v24 = vsub.f32 1.5, %v708_v49  ;;  %v490_v34 = vpop.permute.xlu2 %489  ;;  %v2788_v23 = vadd.f32 %v2653_v58, %v787_v28  ;;  %vm2872_vm9 = vmor %vm741_vm8, %vm742_vm6 }
 0x358   :  { %v454_v46 = vpop.permute.xlu1 %453  ;;  %v2790_v0 = vadd.f32 1e-05, %v577_v35  ;;  %v1977_v15 = vpop.eup %1976 }
 0x359   :  { %v442_v14 = vpop.permute.xlu0 %441  ;;  %v537_v6 = vsel %vm2609_vm2, %v454_v46, %v2685_v47  ;;  %v820_v33 = vpack.c.bf16 %v2788_v23, %v2785_v57  ;;  %v1979_v37 = vpop.eup %1978  ;;  %v656_v38 = vmul.f32 %v1977_v15, %v2764_v43  ;;  %v710_v56 = vmul.f32 %v2742_v21, %v709_v24 }
 0x35a   :  { %v531_v5 = vsel %vm2609_vm2, %v442_v14, %v490_v34  ;;  %v553_v17 = vsub.f32 %v2497_v59, %v537_v6  ;;  %1980 = vrsqrt.f32 %v2790_v0  ;;  %v716_v47 = vmul.f32 %v1979_v37, %v2766_v53 }
 0x35b   :  { %1917 = vmatmul.msk.bf16.gmra.mxu2 %vm163_vm0, %v820_v33  ;;  %v657_v59 = vmul.f32 %v1977_v15, %v656_v38  ;;  %v547_v25 = vsub.f32 %v2467_v41, %v531_v5  ;;  %v714_v12 = vsel %vm2813_vm10, %v2742_v21, %v710_v56  ;;  %vm662_vm12 = vweird.f32 %v1977_v15 }
 0x35c   :  { %v717_v22 = vmul.f32 %v1979_v37, %v716_v47  ;;  %v2810_v48 = vmul.f32 0.5, %v553_v17  ;;  %vm722_vm13 = vweird.f32 %v1979_v37  ;;  %v738_v46 = vmul.f32 0.5, %v737_v42  ;;  %vm663_vm15 = vmor %vm661_vm11, %vm662_vm12 }
 0x35d   :  { %v658_v50 = vmul.f32 0.5, %v657_v59  ;;  %v2817_v9 = vmul.f32 0.5, %v547_v25  ;;  %v775_v5 = vmul.f32 %v714_v12, %v2704_v29  ;;  %vm723_vm3 = vmor %vm721_vm14, %vm722_vm13  ;;  %vm651_vm5 = vweird.f32 %v2790_v0 }
 0x35e   :  { %v718_v41 = vmul.f32 0.5, %v717_v22  ;;  %v585_v63 = vmul.f32 %v2810_v48, %v2810_v48  ;;  %v739_v53 = vsub.f32 1.5, %v738_v46 }
 0x35f   :  { %v659_v49 = vsub.f32 1.5, %v658_v50  ;;  %v579_v28 = vmul.f32 %v2817_v9, %v2817_v9  ;;  %v794_v43 = vmul.f32 %v2648_v20, %v775_v5 }
 0x360   :  { %v460_v51 = vpop.permute.xlu1 %459  ;;  %v1981_v55 = vpop.eup %1980  ;;  %v719_v24 = vsub.f32 1.5, %v718_v41  ;;  %v2831_v34 = vadd.f32 1e-05, %v585_v63 }
 0x361   :  { %v540_v35 = vsel %vm2609_vm2, %v460_v51, %v2748_v40  ;;  %v646_v21 = vmul.f32 %v1981_v55, %v2790_v0  ;;  %v660_v14 = vmul.f32 %v1977_v15, %v659_v49  ;;  %v2839_v2 = vadd.f32 1e-05, %v579_v28  ;;  %v492_v46 = vpop.permute.xlu0 %491 }
 0x362   :  { %v556_v6 = vsub.f32 %v2515_v11, %v540_v35  ;;  %v720_v17 = vmul.f32 %v1979_v37, %v719_v24  ;;  %1982 = vrsqrt.f32 %v2831_v34  ;;  %vm652_vm4 = vweird.f32 %v1981_v55 }
 0x363   :  { %v647_v33 = vmul.f32 %v1981_v55, %v646_v21  ;;  %v664_v40 = vsel %vm663_vm15, %v1977_v15, %v660_v14  ;;  %1984 = vrsqrt.f32 %v2839_v2  ;;  %vm653_vm7 = vmor %vm651_vm5, %vm652_vm4  ;;  %vm731_vm11 = vweird.f32 %v2831_v34 }
 0x364   :  { %v2841_v38 = vmul.f32 0.5, %v556_v6  ;;  %v724_v56 = vsel %vm723_vm3, %v1979_v37, %v720_v17  ;;  %v770_v59 = vmul.f32 %v664_v40, %v2737_v18  ;;  %v740_v18 = vmul.f32 %v2782_v60, %v739_v53 }
 0x365   :  { %v648_v47 = vmul.f32 0.5, %v647_v33  ;;  %v776_v11 = vmul.f32 %v724_v56, %v2739_v36 }
 0x366   :  { %v588_v29 = vmul.f32 %v2841_v38, %v2841_v38  ;;  %v789_v41 = vmul.f32 %v2648_v20, %v770_v59 }
 0x367   :  { %v649_v25 = vsub.f32 1.5, %v648_v47  ;;  %v795_v22 = vmul.f32 %v2648_v20, %v776_v11 }
 0x368   :  { %v506_v15 = vpop.permute.xlu1 %505  ;;  %v2850_v42 = vadd.f32 1e-05, %v588_v29  ;;  %v1983_v37 = vpop.eup %1982  ;;  %v2887_v5 = vadd.f32 %v2653_v58, %v789_v41 }
 0x369   :  { %v539_v36 = vsel %vm2609_vm2, %v2759_v30, %v506_v15  ;;  %v650_v44 = vmul.f32 %v1981_v55, %v649_v25  ;;  %v726_v12 = vmul.f32 %v1983_v37, %v2831_v34  ;;  %v2870_v49 = vadd.f32 %v2653_v58, %v795_v22  ;;  %v2878_v35 = vpop.eup %1984 }
 0x36a   :  { %v555_v50 = vsub.f32 %v2507_v3, %v539_v36  ;;  %1986 = vrsqrt.f32 %v2850_v42  ;;  %v2867_v3 = vadd.f32 %v2653_v58, %v794_v43  ;;  %vm732_vm10 = vweird.f32 %v1983_v37 }
 0x36b   :  { %v654_v30 = vsel %vm653_vm7, %v1981_v55, %v650_v44  ;;  %v727_v51 = vmul.f32 %v1983_v37, %v726_v12  ;;  %v666_v47 = vmul.f32 %v2878_v35, %v2839_v2  ;;  %vm733_vm12 = vmor %vm731_vm11, %vm732_vm10  ;;  %vm761_vm14 = vweird.f32 %v2850_v42 }
 0x36c   :  { %v2863_v63 = vmul.f32 0.5, %v555_v50  ;;  %v769_v0 = vmul.f32 %v654_v30, %v2776_v45  ;;  %v744_v45 = vsel %vm2872_vm9, %v2782_v60, %v740_v18  ;;  %v824_v21 = vpack.c.bf16 %v2870_v49, %v2867_v3 }
 0x36d   :  { %v728_v24 = vmul.f32 0.5, %v727_v51  ;;  %v778_v56 = vmul.f32 %v744_v45, %v2707_v8  ;;  %v667_v8 = vmul.f32 %v2878_v35, %v666_v47  ;;  %vm672_vm5 = vweird.f32 %v2878_v35 }
 0x36e   :  { %v587_v32 = vmul.f32 %v2863_v63, %v2863_v63  ;;  %v788_v55 = vmul.f32 %v2648_v20, %v769_v0  ;;  %1921 = vmatmul.msk.bf16.gmra.mxu3 %vm163_vm0, %v824_v21  ;;  %vm671_vm7 = vweird.f32 %v2839_v2 }
 0x36f   :  { %v729_v33 = vsub.f32 1.5, %v728_v24  ;;  %v797_v44 = vmul.f32 %v2648_v20, %v778_v56  ;;  %v668_v30 = vmul.f32 0.5, %v667_v8  ;;  %vm673_vm8 = vmor %vm671_vm7, %vm672_vm5 }
 0x370   :  { %v603_v14 = vadd.f32 1e-05, %v587_v32  ;;  %v444_v6 = vpop.permute.xlu1 %443  ;;  %v1987_v17 = vpop.eup %1986  ;;  %v2893_v40 = vadd.f32 %v2653_v58, %v788_v55 }
 0x371   :  { %v532_v60 = vsel %vm2609_vm2, %v444_v6, %v492_v46  ;;  %v756_v53 = vmul.f32 %v1987_v17, %v2850_v42  ;;  %v730_v11 = vmul.f32 %v1983_v37, %v729_v33  ;;  %v2912_v51 = vadd.f32 %v2653_v58, %v797_v44 }
 0x372   :  { %1988 = vrsqrt.f32 %v603_v14  ;;  %v548_v29 = vsub.f32 %v2483_v52, %v532_v60  ;;  %v821_v43 = vpack.c.bf16 %v2887_v5, %v2893_v40  ;;  %vm762_vm13 = vweird.f32 %v1987_v17 }
 0x373   :  { %v757_v59 = vmul.f32 %v1987_v17, %v756_v53  ;;  %v734_v25 = vsel %vm733_vm12, %v1983_v37, %v730_v11  ;;  %v669_v45 = vsub.f32 1.5, %v668_v30  ;;  %vm763_vm15 = vmor %vm761_vm14, %vm762_vm13  ;;  %vm751_vm4 = vweird.f32 %v603_v14 }
 0x374   :  { %v564_v15 = vmul.f32 0.5, %v548_v29  ;;  %1918 = vmatmul.msk.bf16.gmra.mxu2 %vm163_vm0, %v821_v43  ;;  %v777_v22 = vmul.f32 %v734_v25, %v2810_v48 }
 0x375   :  { %v758_v36 = vmul.f32 0.5, %v757_v59  ;;  %v670_v6 = vmul.f32 %v2878_v35, %v669_v45 }
 0x376   :  { %v580_v50 = vmul.f32 %v564_v15, %v564_v15  ;;  %v796_v52 = vmul.f32 %v2648_v20, %v777_v22 }
 0x377   :  { %v759_v18 = vsub.f32 1.5, %v758_v36 }
 0x378   :  { %v1989_v34 = vpop.eup %1988  ;;  %v596_v41 = vadd.f32 1e-05, %v580_v50  ;;  %v2909_v37 = vadd.f32 %v2653_v58, %v796_v52 }
 0x379   :  { %v746_v12 = vmul.f32 %v1989_v34, %v603_v14  ;;  %v760_v48 = vmul.f32 %v1987_v17, %v759_v18  ;;  %vm752_vm3 = vweird.f32 %v1989_v34 }
 0x37a   :  { %1990 = vrsqrt.f32 %v596_v41  ;;  %v825_v32 = vpack.c.bf16 %v2912_v51, %v2909_v37  ;;  %vm753_vm6 = vmor %vm751_vm4, %vm752_vm3  ;;  %vm681_vm10 = vweird.f32 %v596_v41 }
 0x37b   :  { %v747_v0 = vmul.f32 %v1989_v34, %v746_v12  ;;  %v764_v24 = vsel %vm763_vm15, %v1987_v17, %v760_v48  ;;  %v674_v17 = vsel %vm673_vm8, %v2878_v35, %v670_v6 }
 0x37c   :  { %v780_v60 = vmul.f32 %v764_v24, %v2841_v38  ;;  %v771_v43 = vmul.f32 %v674_v17, %v2817_v9 }
 0x37d   :  { %v748_v28 = vmul.f32 0.5, %v747_v0 }
 0x37e   :  { %1922 = vmatmul.msk.bf16.gmra.mxu3 %vm163_vm0, %v825_v32  ;;  %v799_v11 = vmul.f32 %v2648_v20, %v780_v60  ;;  %v790_v35 = vmul.f32 %v2648_v20, %v771_v43 }
 0x37f   :  { %v749_v55 = vsub.f32 1.5, %v748_v28 }
 0x380   :  { %v1991_v21 = vpop.eup %1990  ;;  %v2931_v2 = vadd.f32 %v2653_v58, %v799_v11  ;;  %v2939_v9 = vadd.f32 %v2653_v58, %v790_v35 }
 0x381   :  { %v750_v46 = vmul.f32 %v1989_v34, %v749_v55  ;;  %v676_v33 = vmul.f32 %v1991_v21, %v596_v41  ;;  %vm682_vm9 = vweird.f32 %v1991_v21 }
 0x382   :  { %vm683_vm11 = vmor %vm681_vm10, %vm682_vm9 }
 0x383   :  { %v754_v56 = vsel %vm753_vm6, %v1989_v34, %v750_v46  ;;  %v677_v47 = vmul.f32 %v1991_v21, %v676_v33 }
 0x384   :  { %v779_v42 = vmul.f32 %v754_v56, %v2863_v63 }
 0x385   :  { %v678_v53 = vmul.f32 0.5, %v677_v47  ;;  %v2958_v47 = vld [vmem:[%s3620_s7] ss:$0 sm:$0xff] }
 0x386   :  { %v798_v14 = vmul.f32 %v2648_v20, %v779_v42 }
 0x387   :  { %v679_v29 = vsub.f32 1.5, %v678_v53 }
 0x388   :  { %v2928_v38 = vadd.f32 %v2653_v58, %v798_v14 }
 0x389   :  { %v680_v59 = vmul.f32 %v1991_v21, %v679_v29 }
 0x38a   :  { %v826_v8 = vpack.c.bf16 %v2931_v2, %v2928_v38 }
 0x38b   :  { %v684_v63 = vsel %vm683_vm11, %v1991_v21, %v680_v59 }
 0x38c   :  { %v772_v25 = vmul.f32 %v684_v63, %v564_v15  ;;  %v872_v15 = vpop.f32.mrf.mxu2 }
 0x38e   :  { %v791_v22 = vmul.f32 %v2648_v20, %v772_v25  ;;  %1923 = vmatmul.msk.bf16.gmra.mxu3 %vm163_vm0, %v826_v8 }
 0x390   :  { %v2942_v36 = vadd.f32 %v2653_v58, %v791_v22 }
 0x392   :  { %v822_v44 = vpack.c.bf16 %v2942_v36, %v2939_v9 }
 0x394   :  { %1919 = vmatmul.msk.bf16.gmra.mxu2 %vm163_vm0, %v822_v44  ;;  %v874_v52 = vpop.f32.mrf.mxu2 }
 0x395   :  { %v912_v42 = vpack.c.bf16 %v874_v52, %v872_v15 }
 0x3d6   :  { %v892_v50 = vpop.f32.mrf.mxu3 }
 0x3de   :  { %v894_v34 = vpop.f32.mrf.mxu3  ;;  %v877_v12 = vpop.f32.mrf.mxu2 }
 0x3df   :  { %v916_v46 = vpack.c.bf16 %v894_v34, %v892_v50 }
 0x3e6   :  { %v879_v30 = vpop.f32.mrf.mxu2 }
 0x3e7   :  { %v913_v56 = vpack.c.bf16 %v879_v30, %v877_v12 }
 0x3f1   :  { %v897_v18 = vpop.f32.mrf.mxu3 }
 0x3f7   :  { %v882_v48 = vpop.f32.mrf.mxu2 }
 0x3f9   :  { %v899_v20 = vpop.f32.mrf.mxu3 }
 0x3fa   :  { %v917_v21 = vpack.c.bf16 %v899_v20, %v897_v18 }
 0x3ff   :  { %v884_v32 = vpop.f32.mrf.mxu2 }
 0x400   :  { %v914_v60 = vpack.c.bf16 %v884_v32, %v882_v48 }
 0x401   :  { %v902_v41 = vpop.f32.mrf.mxu3 }
 0x409   :  { %v904_v0 = vpop.f32.mrf.mxu3 }
 0x40a   :  { %v918_v24 = vpack.c.bf16 %v904_v0, %v902_v41 }
 0x411   :  { %v907_v28 = vpop.f32.mrf.mxu3 }
 0x417   :  { %v887_v55 = vpop.f32.mrf.mxu2 }
 0x419   :  { %v909_v58 = vpop.f32.mrf.mxu3 }
 0x41a   :  { %v919_v45 = vpack.c.bf16 %v909_v58, %v907_v28 }
 0x41c   :  { %924 = vmatpush.bf16.msrb.mxu3 %v919_v45 }
 0x41f   :  { %v889_v6 = vpop.f32.mrf.mxu2 }
 0x420   :  { %925 = vmatpush.bf16.msrb.mxu3 %v918_v24  ;;  %v915_v33 = vpack.c.bf16 %v889_v6, %v887_v55 }
 0x424   :  { %926 = vmatpush.bf16.msrb.mxu3 %v917_v21 }
 0x428   :  { %927 = vmatpush.bf16.msrb.mxu3 %v916_v46 }
 0x42c   :  { %928 = vmatpush.bf16.msrb.mxu3 %v915_v33 }
 0x430   :  { %929 = vmatpush.bf16.msrb.mxu3 %v914_v60 }
 0x434   :  { %930 = vmatpush.bf16.msrb.mxu3 %v913_v56 }
 0x438   :  { %931 = vmatpush.bf16.msrb.mxu3 %v912_v42 }
 0x43b   :  { %932 = vmatmul.bf16.vlgmr.msrb.gmra.mxu3 %v2365_v62 }
 0x44b   :  { %937 = vmatmul.bf16.gmra.mxu3 %v2374_v1 }
 0x45b   :  { %942 = vmatmul.bf16.gmra.mxu3 %v2383_v4 }
 0x46b   :  { %947 = vmatmul.bf16.gmra.mxu3 %v2392_v7 }
 0x47b   :  { %952 = vmatmul.bf16.gmra.mxu3 %v2401_v10 }
 0x48b   :  { %957 = vmatmul.bf16.gmra.mxu3 %v2410_v13 }
 0x49b   :  { %962 = vmatmul.bf16.gmra.mxu3 %v2419_v16 }
 0x4ab   :  { %967 = vmatmul.bf16.gmra.mxu3 %v2428_v19 }
 0x4be   :  { %v933_v17 = vpop.f32.mrf.mxu3 }
 0x4bf   :  { %v934_v14 = vadd.f32 %v2958_v47, %v933_v17 }
 0x4c1   :  { %v2961_v53 = vmax.f32 %v934_v14, 0.0 }
 0x4c3   :  { %991 = vrot.lane.b32.xlu1 %v2961_v53, %s2195_s19 }
 0x4c6   :  { %v935_v11 = vpop.f32.mrf.mxu3 }
 0x4c7   :  { %v936_v29 = vadd.f32 %v2958_v47, %v935_v11 }
 0x4c9   :  { %v2966_v43 = vmax.f32 %v936_v29, 0.0 }
 0x4cb   :  { %994 = vrot.lane.b32.xlu2 %v2966_v43, %s2195_s19 }
 0x4ce   :  { %v938_v59 = vpop.f32.mrf.mxu3 }
 0x4cf   :  { %v939_v63 = vadd.f32 %v2958_v47, %v938_v59 }
 0x4d1   :  { %v2971_v35 = vmax.f32 %v939_v63, 0.0 }
 0x4d3   :  { %997 = vrot.lane.b32.xlu0 %v2971_v35, %s2195_s19 }
 0x4d6   :  { %v940_v25 = vpop.f32.mrf.mxu3 }
 0x4d7   :  { %v941_v8 = vadd.f32 %v2958_v47, %v940_v25 }
 0x4d9   :  { %v2976_v22 = vmax.f32 %v941_v8, 0.0 }
 0x4db   :  { %1000 = vrot.lane.b32.xlu1 %v2976_v22, %s2195_s19 }
 0x4de   :  { %v943_v44 = vpop.f32.mrf.mxu3 }
 0x4df   :  { %v944_v50 = vadd.f32 %v2958_v47, %v943_v44 }
 0x4e1   :  { %v2981_v15 = vmax.f32 %v944_v50, 0.0 }
 0x4e3   :  { %1003 = vrot.lane.b32.xlu2 %v2981_v15, %s2195_s19 }
 0x4e6   :  { %v945_v34 = vpop.f32.mrf.mxu3 }
 0x4e7   :  { %v946_v52 = vadd.f32 %v2958_v47, %v945_v34 }
 0x4e9   :  { %v2986_v18 = vmax.f32 %v946_v52, 0.0 }
 0x4eb   :  { %1006 = vrot.lane.b32.xlu0 %v2986_v18, %s2195_s19 }
 0x4ee   :  { %v948_v12 = vpop.f32.mrf.mxu3 }
 0x4ef   :  { %v949_v20 = vadd.f32 %v2958_v47, %v948_v12 }
 0x4f1   :  { %v2991_v41 = vmax.f32 %v949_v20, 0.0 }
 0x4f3   :  { %1009 = vrot.lane.b32.xlu0 %v2991_v41, %s2195_s19 }
 0x4f6   :  { %v950_v30 = vpop.f32.mrf.mxu3 }
 0x4f7   :  { %v951_v0 = vadd.f32 %v2958_v47, %v950_v30 }
 0x4f9   :  { %v2996_v48 = vmax.f32 %v951_v0, 0.0 }
 0x4fb   :  { %1012 = vrot.lane.b32.xlu1 %v2996_v48, %s2195_s19 }
 0x4fe   :  { %v953_v28 = vpop.f32.mrf.mxu3 }
 0x4ff   :  { %v954_v32 = vadd.f32 %v2958_v47, %v953_v28 }
 0x501   :  { %v3001_v58 = vmax.f32 %v954_v32, 0.0 }
 0x503   :  { %1015 = vrot.lane.b32.xlu1 %v3001_v58, %s2195_s19 }
 0x506   :  { %v955_v45 = vpop.f32.mrf.mxu3 }
 0x507   :  { %v956_v55 = vadd.f32 %v2958_v47, %v955_v45 }
 0x509   :  { %v3006_v24 = vmax.f32 %v956_v55, 0.0 }
 0x50b   :  { %1018 = vrot.lane.b32.xlu2 %v3006_v24, %s2195_s19 }
 0x50e   :  { %v958_v21 = vpop.f32.mrf.mxu3 }
 0x50f   :  { %v959_v11 = vadd.f32 %v2958_v47, %v958_v21 }
 0x511   :  { %v3024_v59 = vmax.f32 %v959_v11, 0.0 }
 0x516   :  { %v960_v46 = vpop.f32.mrf.mxu3 }
 0x517   :  { %v961_v6 = vadd.f32 %v2958_v47, %v960_v46 }
 0x519   :  { %v3011_v33 = vmax.f32 %v961_v6, 0.0 }
 0x51b   :  { %1024 = vrot.lane.b32.xlu0 %v3011_v33, %s2195_s19 }
 0x51e   :  { %v963_v60 = vpop.f32.mrf.mxu3 }
 0x51f   :  { %v964_v56 = vadd.f32 %v2958_v47, %v963_v60 }
 0x521   :  { %v3016_v42 = vmax.f32 %v964_v56, 0.0 }
 0x523   :  { %1027 = vrot.lane.b32.xlu0 %v3016_v42, %s2195_s19 }
 0x525   :  { %v995_v17 = vpop.permute.xlu2 %994 }
 0x526   :  { %v996_v14 = vsel %vm316_vm1, %v995_v17, %v2966_v43  ;;  %v965_v29 = vpop.f32.mrf.mxu3 }
 0x527   :  { %1041 = vrot.lane.b32.xlu2 %v996_v14, %s2195_s19  ;;  %v966_v34 = vadd.f32 %v2958_v47, %v965_v29 }
 0x529   :  { %v3037_v12 = vmax.f32 %v966_v34, 0.0 }
 0x52e   :  { %v968_v63 = vpop.f32.mrf.mxu3 }
 0x52f   :  { %1021 = vrot.lane.b32.xlu2 %v3024_v59, %s2195_s19  ;;  %v969_v44 = vadd.f32 %v2958_v47, %v968_v63 }
 0x531   :  { %v3032_v50 = vmax.f32 %v969_v44, 0.0 }
 0x535   :  { %v992_v25 = vpop.permute.xlu1 %991 }
 0x536   :  { %v993_v8 = vsel %vm316_vm1, %v992_v25, %v2961_v53  ;;  %v970_v52 = vpop.f32.mrf.mxu3 }
 0x537   :  { %1039 = vrot.lane.b32.xlu1 %v993_v8, %s2195_s19  ;;  %v971_v0 = vadd.f32 %v2958_v47, %v970_v52 }
 0x539   :  { %v3045_v28 = vmax.f32 %v971_v0, 0.0 }
 0x53d   :  { %v1004_v55 = vpop.permute.xlu2 %1003 }
 0x53e   :  { %v1005_v21 = vsel %vm316_vm1, %v1004_v55, %v2981_v15 }
 0x53f   :  { %1033 = vrot.lane.b32.xlu1 %v3032_v50, %s2195_s19 }
 0x545   :  { %v998_v20 = vpop.permute.xlu0 %997 }
 0x546   :  { %v999_v30 = vsel %vm316_vm1, %v998_v20, %v2971_v35 }
 0x547   :  { %1043 = vrot.lane.b32.xlu2 %v999_v30, %s2195_s19  ;;  %1030 = vrot.lane.b32.xlu1 %v3037_v12, %s2195_s19 }
 0x54d   :  { %v1001_v32 = vpop.permute.xlu1 %1000 }
 0x54e   :  { %v1002_v45 = vsel %vm316_vm1, %v1001_v32, %v2976_v22 }
 0x54f   :  { %1036 = vrot.lane.b32.xlu2 %v3045_v28, %s2195_s19  ;;  %1045 = vrot.lane.b32.xlu0 %v1002_v45, %s2195_s19 }
 0x557   :  { %1047 = vrot.lane.b32.xlu0 %v1005_v21, %s2195_s19 }
 0x55d   :  { %v1007_v46 = vpop.permute.xlu0 %1006 }
 0x55e   :  { %v1008_v47 = vsel %vm316_vm1, %v1007_v46, %v2986_v18 }
 0x55f   :  { %1049 = vrot.lane.b32.xlu1 %v1008_v47, %s2195_s19 }
 0x565   :  { %v1010_v6 = vpop.permute.xlu0 %1009  ;;  %v1019_v14 = vpop.permute.xlu2 %1018 }
 0x566   :  { %v1011_v60 = vsel %vm316_vm1, %v1010_v6, %v2991_v41  ;;  %v1020_v32 = vsel %vm316_vm1, %v1019_v14, %v3006_v24 }
 0x567   :  { %1051 = vrot.lane.b32.xlu2 %v1011_v60, %s2195_s19 }
 0x56d   :  { %v1013_v56 = vpop.permute.xlu1 %1012 }
 0x56e   :  { %v1014_v17 = vsel %vm316_vm1, %v1013_v56, %v2996_v48 }
 0x56f   :  { %1053 = vrot.lane.b32.xlu0 %v1014_v17, %s2195_s19 }
 0x575   :  { %v1016_v25 = vpop.permute.xlu1 %1015 }
 0x576   :  { %v1017_v30 = vsel %vm316_vm1, %v1016_v25, %v3001_v58 }
 0x581   :  { %v1042_v11 = vpop.permute.xlu2 %1041 }
 0x582   :  { %v1072_v29 = vsel %vm316_vm1, %v1042_v11, %v2966_v43 }
 0x583   :  { %1105 = vrot.lane.b32.xlu2 %v1072_v29, %s2197_s3 }
 0x589   :  { %v1022_v63 = vpop.permute.xlu2 %1021 }
 0x58a   :  { %v1023_v60 = vsel %vm316_vm1, %v1022_v63, %v3024_v59 }
 0x58d   :  { %v1025_v20 = vpop.permute.xlu0 %1024 }
 0x58e   :  { %v1026_v56 = vsel %vm316_vm1, %v1025_v20, %v3011_v33 }
 0x595   :  { %v1028_v0 = vpop.permute.xlu0 %1027 }
 0x5a1   :  { %v1044_v8 = vpop.permute.xlu2 %1043 }
 0x5a2   :  { %v1073_v44 = vsel %vm316_vm1, %v1044_v8, %v2971_v35 }
 0x5a3   :  { %1107 = vrot.lane.b32.xlu2 %v1073_v44, %s2197_s3 }
 0x5a9   :  { %v1040_v34 = vpop.permute.xlu1 %1039  ;;  %v1037_v17 = vpop.permute.xlu2 %1036 }
 0x5aa   :  { %v1071_v52 = vsel %vm316_vm1, %v1040_v34, %v2961_v53  ;;  %v1038_v8 = vsel %vm316_vm1, %v1037_v17, %v3045_v28 }
 0x5ab   :  { %1151 = vrot.lane.b32.xlu0 %v1071_v52, %s2196_s1  ;;  %1103 = vrot.lane.b32.xlu1 %v1071_v52, %s2197_s3  ;;  %v1029_v52 = vsel %vm316_vm1, %v1028_v0, %v3016_v42 }
 0x5b1   :  { %v1034_v45 = vpop.permute.xlu1 %1033 }
 0x5b2   :  { %v1035_v25 = vsel %vm316_vm1, %v1034_v45, %v3032_v50  ;;  %v1523_v45 = vld [vmem:[#allocation7 + $0x30] sm:$0xff] }
 0x5b3   :  { %1055 = vrot.lane.b32.xlu0 %v1017_v30, %s2195_s19  ;;  %1153 = vrot.lane.b32.xlu1 %v1072_v29, %s2196_s1 }
 0x5b9   :  { %v1031_v46 = vpop.permute.xlu1 %1030 }
 0x5ba   :  { %v1032_v20 = vsel %vm316_vm1, %v1031_v46, %v3037_v12  ;;  %v1522_v46 = vld [vmem:[#allocation7 + $0x28] sm:$0xff] }
 0x5bb   :  { %1057 = vrot.lane.b32.xlu1 %v1020_v32, %s2195_s19 }
 0x5c1   :  { %v1046_v55 = vpop.permute.xlu0 %1045  ;;  %v1052_v29 = vpop.permute.xlu2 %1051 }
 0x5c2   :  { %v1074_v21 = vsel %vm316_vm1, %v1046_v55, %v2976_v22  ;;  %v1077_v63 = vsel %vm316_vm1, %v1052_v29, %v2991_v41  ;;  %v1524_v55 = vld [vmem:[#allocation7 + $0x38] sm:$0xff]  ;;  %v1519_v29 = vld [vmem:[#allocation7 + $0x10] sm:$0xff] }
 0x5c3   :  { %1157 = vrot.lane.b32.xlu2 %v1074_v21, %s2196_s1  ;;  %1109 = vrot.lane.b32.xlu0 %v1074_v21, %s2197_s3  ;;  %v1528_v21 = vpack.c.bf16 %v1524_v55, %v1523_v45  ;;  %v1517_v55 = vld [vmem:[#allocation7] sm:$0xff] }
 0x5c4   :  { %1155 = vrot.lane.b32.xlu1 %v1073_v44, %s2196_s1 }
 0x5c5   :  { %1557 = vmatpush.bf16.msrb.mxu0 %v1528_v21  ;;  %1940 = vmatpush.bf16.msra.mxu1 %v1528_v21  ;;  %v1518_v21 = vld [vmem:[#allocation7 + $0x8] sm:$0xff] }
 0x5c9   :  { %v1048_v47 = vpop.permute.xlu0 %1047 }
 0x5ca   :  { %v1075_v6 = vsel %vm316_vm1, %v1048_v47, %v2981_v15 }
 0x5cb   :  { %1111 = vrot.lane.b32.xlu2 %v1075_v6, %s2197_s3  ;;  %1059 = vrot.lane.b32.xlu0 %v1023_v60, %s2195_s19 }
 0x5cc   :  { %1061 = vrot.lane.b32.xlu1 %v1026_v56, %s2195_s19  ;;  %v1521_v56 = vld [vmem:[#allocation7 + $0x20] sm:$0xff] }
 0x5d1   :  { %v1050_v14 = vpop.permute.xlu1 %1049 }
 0x5d2   :  { %v1076_v11 = vsel %vm316_vm1, %v1050_v14, %v2986_v18  ;;  %v1527_v14 = vpack.c.bf16 %v1522_v46, %v1521_v56 }
 0x5d3   :  { %1161 = vrot.lane.b32.xlu2 %v1076_v11, %s2196_s1  ;;  %1113 = vrot.lane.b32.xlu0 %v1076_v11, %s2197_s3 }
 0x5d4   :  { %1159 = vrot.lane.b32.xlu1 %v1075_v6, %s2196_s1  ;;  %1558 = vmatpush.bf16.msrb.mxu0 %v1527_v14 }
 0x5d5   :  { %1941 = vmatpush.bf16.msra.mxu1 %v1527_v14 }
 0x5db   :  { %1115 = vrot.lane.b32.xlu2 %v1077_v63, %s2197_s3  ;;  %1067 = vrot.lane.b32.xlu0 %v1035_v25, %s2195_s19 }
 0x5dc   :  { %1069 = vrot.lane.b32.xlu1 %v1038_v8, %s2195_s19 }
 0x5dd   :  { %v1106_v30 = vpop.permute.xlu2 %1105 }
 0x5e1   :  { %v1054_v44 = vpop.permute.xlu0 %1053 }
 0x5e2   :  { %v1078_v34 = vsel %vm316_vm1, %v1054_v44, %v2996_v48 }
 0x5e3   :  { %1165 = vrot.lane.b32.xlu2 %v1078_v34, %s2196_s1  ;;  %1117 = vrot.lane.b32.xlu0 %v1078_v34, %s2197_s3 }
 0x5e4   :  { %1163 = vrot.lane.b32.xlu1 %v1077_v63, %s2196_s1  ;;  %v1520_v63 = vld [vmem:[#allocation7 + $0x18] sm:$0xff] }
 0x5e5   :  { %v1526_v8 = vpack.c.bf16 %v1520_v63, %v1519_v29 }
 0x5e7   :  { %1559 = vmatpush.bf16.msrb.mxu0 %v1526_v8  ;;  %1942 = vmatpush.bf16.msra.mxu1 %v1526_v8 }
 0x5eb   :  { %1063 = vrot.lane.b32.xlu2 %v1029_v52, %s2195_s19  ;;  %1065 = vrot.lane.b32.xlu0 %v1032_v20, %s2195_s19 }
 0x5fd   :  { %v3120_v32 = vpop.permute.xlu2 %1107 }
 0x61d   :  { %v1158_v47 = vpop.permute.xlu2 %1157  ;;  %v1152_v6 = vpop.permute.xlu0 %1151 }
 0x61e   :  { %v1104_v60 = vpop.permute.xlu1 %1103 }
 0x61f   :  { %v1199_v0 = vsel %vm2609_vm2, %v1104_v60, %v1152_v6  ;;  %v1525_v60 = vpack.c.bf16 %v1518_v21, %v1517_v55 }
 0x620   :  { %v1215_v17 = vsub.f32 %v2961_v53, %v1199_v0 }
 0x621   :  { %1560 = vmatpush.bf16.msrb.mxu0 %v1525_v60  ;;  %1943 = vmatpush.bf16.msra.mxu1 %v1525_v60 }
 0x622   :  { %v1231_v11 = vmul.f32 0.5, %v1215_v17 }
 0x624   :  { %v1247_v25 = vmul.f32 %v1231_v11, %v1231_v11 }
 0x625   :  { %v3125_v44 = vpop.permute.xlu2 %1111  ;;  %v1056_v34 = vpop.permute.xlu0 %1055 }
 0x626   :  { %v1263_v52 = vadd.f32 1e-05, %v1247_v25  ;;  %v1154_v20 = vpop.permute.xlu1 %1153  ;;  %v1079_v45 = vsel %vm316_vm1, %v1056_v34, %v3001_v58 }
 0x627   :  { %v1200_v53 = vsel %vm2609_vm2, %v1106_v30, %v1154_v20  ;;  %1119 = vrot.lane.b32.xlu1 %v1079_v45, %s2197_s3  ;;  %1167 = vrot.lane.b32.xlu0 %v1079_v45, %s2196_s1 }
 0x628   :  { %1992 = vrsqrt.f32 %v1263_v52  ;;  %v1216_v6 = vsub.f32 %v2966_v43, %v1200_v53  ;;  %vm1285_vm13 = vweird.f32 %v1263_v52 }
 0x62a   :  { %v1232_v0 = vmul.f32 0.5, %v1216_v6 }
 0x62c   :  { %v1248_v56 = vmul.f32 %v1232_v0, %v1232_v0 }
 0x62d   :  { %v3134_v46 = vpop.permute.xlu2 %1161 }
 0x62e   :  { %v1993_v17 = vpop.eup %1992  ;;  %v1264_v14 = vadd.f32 1e-05, %v1248_v56  ;;  %v1058_v29 = vpop.permute.xlu1 %1057 }
 0x62f   :  { %v1280_v30 = vmul.f32 %v1993_v17, %v1263_v52  ;;  %v1080_v63 = vsel %vm316_vm1, %v1058_v29, %v3006_v24  ;;  %vm1286_vm12 = vweird.f32 %v1993_v17 }
 0x630   :  { %1994 = vrsqrt.f32 %v1264_v14  ;;  %1169 = vrot.lane.b32.xlu1 %v1080_v63, %s2196_s1  ;;  %1121 = vrot.lane.b32.xlu2 %v1080_v63, %s2197_s3  ;;  %vm1287_vm14 = vmor %vm1285_vm13, %vm1286_vm12  ;;  %vm1295_vm3 = vweird.f32 %v1264_v14 }
 0x631   :  { %v1281_v43 = vmul.f32 %v1993_v17, %v1280_v30 }
 0x633   :  { %v1282_v25 = vmul.f32 0.5, %v1281_v43 }
 0x635   :  { %v1283_v8 = vsub.f32 1.5, %v1282_v25  ;;  %v1110_v34 = vpop.permute.xlu0 %1109  ;;  %v3140_v20 = vpop.permute.xlu2 %1115 }
 0x636   :  { %v1995_v45 = vpop.eup %1994  ;;  %v1202_v53 = vsel %vm2609_vm2, %v1110_v34, %v1158_v47  ;;  %v1156_v55 = vpop.permute.xlu1 %1155 }
 0x637   :  { %v1284_v21 = vmul.f32 %v1993_v17, %v1283_v8  ;;  %v1290_v6 = vmul.f32 %v1995_v45, %v1264_v14  ;;  %v1218_v60 = vsub.f32 %v2976_v22, %v1202_v53  ;;  %v1201_v56 = vsel %vm2609_vm2, %v3120_v32, %v1156_v55  ;;  %v3158_v22 = vld [vmem:[%s3621_s8] ss:$0 sm:$0xff] }
 0x638   :  { %v1217_v63 = vsub.f32 %v2971_v35, %v1201_v56  ;;  %vm1296_vm15 = vweird.f32 %v1995_v45  ;;  %v3174_v56 = vld [vmem:[%s3622_s9] ss:$0 sm:$0xff] }
 0x639   :  { %v1291_v29 = vmul.f32 %v1995_v45, %v1290_v6  ;;  %v3148_v30 = vmul.f32 0.5, %v1218_v60  ;;  %v1288_v43 = vsel %vm1287_vm14, %v1993_v17, %v1284_v21  ;;  %vm1297_vm4 = vmor %vm1295_vm3, %vm1296_vm15 }
 0x63a   :  { %v3153_v8 = vmul.f32 0.5, %v1217_v63  ;;  %v1439_v32 = vmul.f32 %v1288_v43, %v1231_v11 }
 0x63b   :  { %v1292_v25 = vmul.f32 0.5, %v1291_v29  ;;  %v1250_v47 = vmul.f32 %v3148_v30, %v3148_v30 }
 0x63c   :  { %v1249_v53 = vmul.f32 %v3153_v8, %v3153_v8  ;;  %v1458_v29 = vmul.f32 %v3158_v22, %v1439_v32 }
 0x63d   :  { %v1293_v52 = vsub.f32 1.5, %v1292_v25  ;;  %v1266_v34 = vadd.f32 1e-05, %v1250_v47  ;;  %v1060_v35 = vpop.permute.xlu0 %1059  ;;  %v3162_v17 = vpop.permute.xlu2 %1165 }
 0x63e   :  { %v1062_v55 = vpop.permute.xlu1 %1061  ;;  %v1081_v21 = vsel %vm316_vm1, %v1060_v35, %v3024_v59  ;;  %v1265_v60 = vadd.f32 1e-05, %v1249_v53  ;;  %v1477_v47 = vadd.f32 %v3174_v56, %v1458_v29 }
 0x63f   :  { %v1294_v6 = vmul.f32 %v1995_v45, %v1293_v52  ;;  %1996 = vrsqrt.f32 %v1266_v34  ;;  %1171 = vrot.lane.b32.xlu1 %v1081_v21, %s2196_s1  ;;  %1123 = vrot.lane.b32.xlu2 %v1081_v21, %s2197_s3  ;;  %v1082_v11 = vsel %vm316_vm1, %v1062_v55, %v3011_v33  ;;  %vm1315_vm6 = vweird.f32 %v1266_v34 }
 0x640   :  { %1998 = vrsqrt.f32 %v1265_v60  ;;  %1125 = vrot.lane.b32.xlu0 %v1082_v11, %s2197_s3  ;;  %vm1305_vm9 = vweird.f32 %v1265_v60 }
 0x641   :  { %v1298_v63 = vsel %vm1297_vm4, %v1995_v45, %v1294_v6 }
 0x642   :  { %v1440_v14 = vmul.f32 %v1298_v63, %v1232_v0 }
 0x644   :  { %v1459_v43 = vmul.f32 %v3158_v22, %v1440_v14 }
 0x645   :  { %v1997_v25 = vpop.eup %1996  ;;  %v1064_v52 = vpop.permute.xlu2 %1063 }
 0x646   :  { %v1114_v53 = vpop.permute.xlu0 %1113  ;;  %v1478_v35 = vadd.f32 %v3174_v56, %v1459_v43  ;;  %v1310_v55 = vmul.f32 %v1997_v25, %v1266_v34  ;;  %v1160_v32 = vpop.permute.xlu1 %1159  ;;  %v3190_v29 = vsel %vm316_vm1, %v1064_v52, %v3016_v42  ;;  %vm1316_vm5 = vweird.f32 %v1997_v25 }
 0x647   :  { %v1204_v21 = vsel %vm2609_vm2, %v1114_v53, %v3134_v46  ;;  %v1999_v45 = vpop.eup %1998  ;;  %v1203_v0 = vsel %vm2609_vm2, %v3125_v44, %v1160_v32  ;;  %1173 = vrot.lane.b32.xlu2 %v1082_v11, %s2196_s1  ;;  %1127 = vrot.lane.b32.xlu1 %v3190_v29, %s2197_s3  ;;  %vm1317_vm8 = vmor %vm1315_vm6, %vm1316_vm5 }
 0x648   :  { %v1220_v6 = vsub.f32 %v2986_v18, %v1204_v21  ;;  %v1311_v63 = vmul.f32 %v1997_v25, %v1310_v55  ;;  %v1300_v14 = vmul.f32 %v1999_v45, %v1265_v60  ;;  %v1219_v43 = vsub.f32 %v2981_v15, %v1203_v0 }
 0x649   :  { %v1493_v18 = vadd.f32 %v1477_v47, %v2657_v61  ;;  %v1494_v53 = vadd.f32 %v1478_v35, %v2660_v54  ;;  %vm1306_vm7 = vweird.f32 %v1999_v45 }
 0x64a   :  { %v3196_v46 = vmul.f32 0.5, %v1220_v6  ;;  %v1312_v44 = vmul.f32 0.5, %v1311_v63  ;;  %v1301_v21 = vmul.f32 %v1999_v45, %v1300_v14  ;;  %v3200_v32 = vmul.f32 0.5, %v1219_v43  ;;  %vm1307_vm10 = vmor %vm1305_vm9, %vm1306_vm7 }
 0x64b   :  { %v1509_v52 = vpack.c.bf16 %v1494_v53, %v1493_v18 }
 0x64c   :  { %v1252_v11 = vmul.f32 %v3196_v46, %v3196_v46  ;;  %v1313_v55 = vsub.f32 1.5, %v1312_v44  ;;  %v1302_v15 = vmul.f32 0.5, %v1301_v21  ;;  %v1251_v0 = vmul.f32 %v3200_v32, %v3200_v32 }
 0x64d   :  { %1924 = vmatmul.msk.bf16.vlgmr.msrb.gmra.mxu0 %vm163_vm0, %v1509_v52 }
 0x64e   :  { %v1268_v6 = vadd.f32 1e-05, %v1252_v11  ;;  %v1068_v61 = vpop.permute.xlu0 %1067  ;;  %v1314_v54 = vmul.f32 %v1997_v25, %v1313_v55  ;;  %v1303_v47 = vsub.f32 1.5, %v1302_v15  ;;  %v1267_v35 = vadd.f32 1e-05, %v1251_v0  ;;  %v1070_v63 = vpop.permute.xlu1 %1069 }
 0x64f   :  { %v1085_v14 = vsel %vm316_vm1, %v1068_v61, %v3032_v50  ;;  %v1086_v34 = vsel %vm316_vm1, %v1070_v63, %v3045_v28 }
 0x650   :  { %2000 = vrsqrt.f32 %v1268_v6  ;;  %1179 = vrot.lane.b32.xlu2 %v1085_v14, %s2196_s1  ;;  %1131 = vrot.lane.b32.xlu0 %v1085_v14, %s2197_s3  ;;  %v1318_v43 = vsel %vm1317_vm8, %v1997_v25, %v1314_v54  ;;  %v1304_v18 = vmul.f32 %v1999_v45, %v1303_v47  ;;  %vm1335_vm13 = vweird.f32 %v1268_v6 }
 0x651   :  { %2002 = vrsqrt.f32 %v1267_v35  ;;  %1133 = vrot.lane.b32.xlu1 %v1086_v34, %s2197_s3  ;;  %v1442_v53 = vmul.f32 %v1318_v43, %v3148_v30  ;;  %vm1325_vm15 = vweird.f32 %v1267_v35 }
 0x652   :  { %v1308_v44 = vsel %vm1307_vm10, %v1999_v45, %v1304_v18 }
 0x653   :  { %v1461_v21 = vmul.f32 %v3158_v22, %v1442_v53  ;;  %v1441_v11 = vmul.f32 %v1308_v44, %v3153_v8 }
 0x655   :  { %v1460_v55 = vmul.f32 %v3158_v22, %v1441_v11  ;;  %v1480_v25 = vadd.f32 %v3174_v56, %v1461_v21 }
 0x656   :  { %v2001_v52 = vpop.eup %2000  ;;  %v1118_v15 = vpop.permute.xlu0 %1117 }
 0x657   :  { %v2003_v0 = vpop.eup %2002  ;;  %v1330_v60 = vmul.f32 %v2001_v52, %v1268_v6  ;;  %v1206_v61 = vsel %vm2609_vm2, %v1118_v15, %v3162_v17  ;;  %v1164_v30 = vpop.permute.xlu1 %1163  ;;  %v1479_v14 = vadd.f32 %v3174_v56, %v1460_v55  ;;  %v1496_v43 = vadd.f32 %v1480_v25, %v2788_v23 }
 0x658   :  { %v1320_v54 = vmul.f32 %v2003_v0, %v1267_v35  ;;  %v1222_v45 = vsub.f32 %v2996_v48, %v1206_v61  ;;  %v1205_v8 = vsel %vm2609_vm2, %v3140_v20, %v1164_v30  ;;  %1181 = vrot.lane.b32.xlu0 %v1086_v34, %s2196_s1  ;;  %vm1336_vm11 = vweird.f32 %v2001_v52 }
 0x659   :  { %v1331_v47 = vmul.f32 %v2001_v52, %v1330_v60  ;;  %v1221_v63 = vsub.f32 %v2991_v41, %v1205_v8  ;;  %v1495_v21 = vadd.f32 %v1479_v14, %v2785_v57  ;;  %vm1326_vm12 = vweird.f32 %v2003_v0  ;;  %vm1337_vm14 = vmor %vm1335_vm13, %vm1336_vm11 }
 0x65a   :  { %v1321_v18 = vmul.f32 %v2003_v0, %v1320_v54  ;;  %v1238_v53 = vmul.f32 0.5, %v1222_v45  ;;  %vm1327_vm3 = vmor %vm1325_vm15, %vm1326_vm12 }
 0x65b   :  { %v1332_v17 = vmul.f32 0.5, %v1331_v47  ;;  %v1237_v44 = vmul.f32 0.5, %v1221_v63  ;;  %v1510_v61 = vpack.c.bf16 %v1496_v43, %v1495_v21 }
 0x65c   :  { %v1322_v48 = vmul.f32 0.5, %v1321_v18  ;;  %v1254_v11 = vmul.f32 %v1238_v53, %v1238_v53 }
 0x65d   :  { %v1333_v15 = vsub.f32 1.5, %v1332_v17  ;;  %v1253_v20 = vmul.f32 %v1237_v44, %v1237_v44  ;;  %1925 = vmatmul.msk.bf16.gmra.mxu0 %vm163_vm0, %v1510_v61 }
 0x65e   :  { %v1323_v34 = vsub.f32 1.5, %v1322_v48  ;;  %v1270_v60 = vadd.f32 1e-05, %v1254_v11  ;;  %v1066_v41 = vpop.permute.xlu0 %1065 }
 0x65f   :  { %v1334_v30 = vmul.f32 %v2001_v52, %v1333_v15  ;;  %v1269_v55 = vadd.f32 1e-05, %v1253_v20  ;;  %v1084_v23 = vsel %vm316_vm1, %v1066_v41, %v3037_v12 }
 0x660   :  { %v1324_v57 = vmul.f32 %v2003_v0, %v1323_v34  ;;  %2004 = vrsqrt.f32 %v1270_v60  ;;  %1129 = vrot.lane.b32.xlu2 %v1084_v23, %s2197_s3  ;;  %1175 = vrot.lane.b32.xlu0 %v3190_v29, %s2196_s1  ;;  %vm1355_vm5 = vweird.f32 %v1270_v60 }
 0x661   :  { %v1338_v25 = vsel %vm1337_vm14, %v2001_v52, %v1334_v30  ;;  %2006 = vrsqrt.f32 %v1269_v55  ;;  %1177 = vrot.lane.b32.xlu1 %v1084_v23, %s2196_s1  ;;  %vm1345_vm7 = vweird.f32 %v1269_v55 }
 0x662   :  { %v1444_v6 = vmul.f32 %v1338_v25, %v3196_v46  ;;  %v1328_v54 = vsel %vm1327_vm3, %v2003_v0, %v1324_v57 }
 0x663   :  { %v1443_v45 = vmul.f32 %v1328_v54, %v3200_v32 }
 0x664   :  { %v1463_v8 = vmul.f32 %v3158_v22, %v1444_v6 }
 0x665   :  { %v1462_v35 = vmul.f32 %v3158_v22, %v1443_v45 }
 0x666   :  { %v2005_v47 = vpop.eup %2004  ;;  %v1482_v63 = vadd.f32 %v3174_v56, %v1463_v8 }
 0x667   :  { %v2007_v14 = vpop.eup %2006  ;;  %v1350_v29 = vmul.f32 %v2005_v47, %v1270_v60  ;;  %v1481_v52 = vadd.f32 %v3174_v56, %v1462_v35  ;;  %vm1356_vm1 = vweird.f32 %v2005_v47 }
 0x668   :  { %v1340_v43 = vmul.f32 %v2007_v14, %v1269_v55  ;;  %v1498_v18 = vadd.f32 %v1482_v63, %v2887_v5  ;;  %vm1346_vm4 = vweird.f32 %v2007_v14  ;;  %vm1357_vm6 = vmor %vm1355_vm5, %vm1356_vm1 }
 0x669   :  { %v1351_v17 = vmul.f32 %v2005_v47, %v1350_v29  ;;  %v1497_v46 = vadd.f32 %v1481_v52, %v2893_v40  ;;  %vm1347_vm8 = vmor %vm1345_vm7, %vm1346_vm4 }
 0x66a   :  { %v1341_v0 = vmul.f32 %v2007_v14, %v1340_v43 }
 0x66b   :  { %v1352_v21 = vmul.f32 0.5, %v1351_v17  ;;  %v1511_v32 = vpack.c.bf16 %v1498_v18, %v1497_v46 }
 0x66c   :  { %v1342_v48 = vmul.f32 0.5, %v1341_v0 }
 0x66d   :  { %v1353_v11 = vsub.f32 1.5, %v1352_v21  ;;  %1926 = vmatmul.msk.bf16.gmra.mxu0 %vm163_vm0, %v1511_v32 }
 0x66e   :  { %v1343_v15 = vsub.f32 1.5, %v1342_v48 }
 0x66f   :  { %v1354_v20 = vmul.f32 %v2005_v47, %v1353_v11 }
 0x670   :  { %v1344_v61 = vmul.f32 %v2007_v14, %v1343_v15 }
 0x671   :  { %v1358_v34 = vsel %vm1357_vm6, %v2005_v47, %v1354_v20 }
 0x672   :  { %v1446_v5 = vmul.f32 %v1358_v34, %v1238_v53  ;;  %v1348_v41 = vsel %vm1347_vm8, %v2007_v14, %v1344_v61 }
 0x673   :  { %v1445_v40 = vmul.f32 %v1348_v41, %v1237_v44 }
 0x674   :  { %v1465_v30 = vmul.f32 %v3158_v22, %v1446_v5 }
 0x675   :  { %v1464_v23 = vmul.f32 %v3158_v22, %v1445_v40 }
 0x676   :  { %v1484_v57 = vadd.f32 %v3174_v56, %v1465_v30 }
 0x677   :  { %v1483_v25 = vadd.f32 %v3174_v56, %v1464_v23 }
 0x678   :  { %v1500_v60 = vadd.f32 %v1484_v57, %v2942_v36 }
 0x679   :  { %v1499_v6 = vadd.f32 %v1483_v25, %v2939_v9 }
 0x67b   :  { %v1512_v54 = vpack.c.bf16 %v1500_v60, %v1499_v6 }
 0x67d   :  { %1927 = vmatmul.msk.bf16.gmra.mxu0 %vm163_vm0, %v1512_v54 }
 0x68a   :  { %v1122_v47 = vpop.permute.xlu2 %1121 }
 0x699   :  { %v1168_v55 = vpop.permute.xlu0 %1167  ;;  %v1120_v45 = vpop.permute.xlu1 %1119 }
 0x69a   :  { %v1207_v53 = vsel %vm2609_vm2, %v1120_v45, %v1168_v55  ;;  %v1124_v43 = vpop.permute.xlu2 %1123 }
 0x69b   :  { %v1223_v44 = vsub.f32 %v3001_v58, %v1207_v53 }
 0x69d   :  { %v1239_v8 = vmul.f32 0.5, %v1223_v44 }
 0x69f   :  { %v1255_v35 = vmul.f32 %v1239_v8, %v1239_v8 }
 0x6a1   :  { %v1271_v63 = vadd.f32 1e-05, %v1255_v35 }
 0x6a2   :  { %v1170_v14 = vpop.permute.xlu1 %1169  ;;  %v1174_v20 = vpop.permute.xlu2 %1173 }
 0x6a3   :  { %v1208_v36 = vsel %vm2609_vm2, %v1122_v47, %v1170_v14  ;;  %2008 = vrsqrt.f32 %v1271_v63  ;;  %vm1365_vm10 = vweird.f32 %v1271_v63 }
 0x6a4   :  { %v1224_v9 = vsub.f32 %v3006_v24, %v1208_v36 }
 0x6a6   :  { %v1240_v29 = vmul.f32 0.5, %v1224_v9 }
 0x6a8   :  { %v1256_v52 = vmul.f32 %v1240_v29, %v1240_v29 }
 0x6a9   :  { %v2009_v18 = vpop.eup %2008 }
 0x6aa   :  { %v1272_v17 = vadd.f32 1e-05, %v1256_v52  ;;  %v1360_v46 = vmul.f32 %v2009_v18, %v1271_v63  ;;  %vm1366_vm9 = vweird.f32 %v2009_v18  ;;  %v1180_v36 = vpop.permute.xlu2 %1179 }
 0x6ab   :  { %vm1367_vm11 = vmor %vm1365_vm10, %vm1366_vm9 }
 0x6ac   :  { %2010 = vrsqrt.f32 %v1272_v17  ;;  %v1361_v0 = vmul.f32 %v2009_v18, %v1360_v46  ;;  %vm1375_vm13 = vweird.f32 %v1272_v17 }
 0x6ae   :  { %v1362_v58 = vmul.f32 0.5, %v1361_v0 }
 0x6b0   :  { %v1363_v21 = vsub.f32 1.5, %v1362_v58 }
 0x6b1   :  { %v1172_v32 = vpop.permute.xlu1 %1171 }
 0x6b2   :  { %v2011_v48 = vpop.eup %2010  ;;  %v1209_v11 = vsel %vm2609_vm2, %v1124_v43, %v1172_v32  ;;  %v1364_v15 = vmul.f32 %v2009_v18, %v1363_v21  ;;  %v1126_v61 = vpop.permute.xlu0 %1125 }
 0x6b3   :  { %v1370_v24 = vmul.f32 %v2011_v48, %v1272_v17  ;;  %v1225_v34 = vsub.f32 %v3024_v59, %v1209_v11  ;;  %v1210_v5 = vsel %vm2609_vm2, %v1126_v61, %v1174_v20  ;;  %vm1376_vm12 = vweird.f32 %v2011_v48 }
 0x6b4   :  { %v1368_v41 = vsel %vm1367_vm11, %v2009_v18, %v1364_v15  ;;  %v1226_v30 = vsub.f32 %v3011_v33, %v1210_v5  ;;  %vm1377_vm14 = vmor %vm1375_vm13, %vm1376_vm12 }
 0x6b5   :  { %v1371_v40 = vmul.f32 %v2011_v48, %v1370_v24  ;;  %v1241_v23 = vmul.f32 0.5, %v1225_v34  ;;  %v1447_v6 = vmul.f32 %v1368_v41, %v1239_v8 }
 0x6b6   :  { %v1242_v25 = vmul.f32 0.5, %v1226_v30 }
 0x6b7   :  { %v1372_v57 = vmul.f32 0.5, %v1371_v40  ;;  %v1257_v60 = vmul.f32 %v1241_v23, %v1241_v23  ;;  %v1466_v44 = vmul.f32 %v3158_v22, %v1447_v6 }
 0x6b8   :  { %v1258_v55 = vmul.f32 %v1242_v25, %v1242_v25 }
 0x6b9   :  { %v1373_v54 = vsub.f32 1.5, %v1372_v57  ;;  %v1273_v45 = vadd.f32 1e-05, %v1257_v60  ;;  %v1128_v33 = vpop.permute.xlu1 %1127  ;;  %v1485_v14 = vadd.f32 %v3174_v56, %v1466_v44 }
 0x6ba   :  { %v1274_v59 = vadd.f32 1e-05, %v1258_v55 }
 0x6bb   :  { %v1374_v53 = vmul.f32 %v2011_v48, %v1373_v54  ;;  %2012 = vrsqrt.f32 %v1273_v45  ;;  %vm1385_vm3 = vweird.f32 %v1273_v45 }
 0x6bc   :  { %2014 = vrsqrt.f32 %v1274_v59  ;;  %vm1395_vm5 = vweird.f32 %v1274_v59 }
 0x6bd   :  { %v1378_v35 = vsel %vm1377_vm14, %v2011_v48, %v1374_v53 }
 0x6be   :  { %v1448_v47 = vmul.f32 %v1378_v35, %v1240_v29  ;;  %v1501_v29 = vadd.f32 %v1485_v14, %v2751_v27 }
 0x6c0   :  { %v1467_v63 = vmul.f32 %v3158_v22, %v1448_v47 }
 0x6c1   :  { %v2013_v8 = vpop.eup %2012 }
 0x6c2   :  { %v1132_v9 = vpop.permute.xlu0 %1131  ;;  %v1380_v52 = vmul.f32 %v2013_v8, %v1273_v45  ;;  %v1486_v18 = vadd.f32 %v3174_v56, %v1467_v63  ;;  %v2015_v17 = vpop.eup %2014  ;;  %vm1386_vm15 = vweird.f32 %v2013_v8 }
 0x6c3   :  { %v1213_v43 = vsel %vm2609_vm2, %v1132_v9, %v1180_v36  ;;  %v1390_v0 = vmul.f32 %v2015_v17, %v1274_v59  ;;  %v1134_v34 = vpop.permute.xlu1 %1133  ;;  %vm1396_vm1 = vweird.f32 %v2015_v17  ;;  %vm1387_vm4 = vmor %vm1385_vm3, %vm1386_vm15 }
 0x6c4   :  { %v1229_v46 = vsub.f32 %v3032_v50, %v1213_v43  ;;  %v1381_v58 = vmul.f32 %v2013_v8, %v1380_v52  ;;  %v1502_v21 = vadd.f32 %v1486_v18, %v2754_v26  ;;  %vm1397_vm6 = vmor %vm1395_vm5, %vm1396_vm1 }
 0x6c5   :  { %v1391_v48 = vmul.f32 %v2015_v17, %v1390_v0 }
 0x6c6   :  { %v3277_v32 = vmul.f32 0.5, %v1229_v46  ;;  %v1382_v11 = vmul.f32 0.5, %v1381_v58  ;;  %v1513_v15 = vpack.c.bf16 %v1502_v21, %v1501_v29 }
 0x6c7   :  { %v1392_v24 = vmul.f32 0.5, %v1391_v48 }
 0x6c8   :  { %v1261_v20 = vmul.f32 %v3277_v32, %v3277_v32  ;;  %v1383_v61 = vsub.f32 1.5, %v1382_v11  ;;  %1928 = vmatmul.msk.bf16.gmra.mxu0 %vm163_vm0, %v1513_v15 }
 0x6c9   :  { %v1393_v27 = vsub.f32 1.5, %v1392_v24 }
 0x6ca   :  { %v1277_v50 = vadd.f32 1e-05, %v1261_v20  ;;  %v1182_v5 = vpop.permute.xlu0 %1181  ;;  %v1384_v26 = vmul.f32 %v2013_v8, %v1383_v61  ;;  %v3282_v41 = vpop.f32.mrf.mxu0 }
 0x6cb   :  { %v1214_v40 = vsel %vm2609_vm2, %v1134_v34, %v1182_v5  ;;  %v1394_v57 = vmul.f32 %v2015_v17, %v1393_v27 }
 0x6cc   :  { %2016 = vrsqrt.f32 %v1277_v50  ;;  %v1230_v30 = vsub.f32 %v3045_v28, %v1214_v40  ;;  %v1388_v60 = vsel %vm1387_vm4, %v2013_v8, %v1384_v26  ;;  %v1130_v8 = vpop.permute.xlu2 %1129 }
 0x6cd   :  { %v1449_v6 = vmul.f32 %v1388_v60, %v1241_v23  ;;  %v1398_v55 = vsel %vm1397_vm6, %v2015_v17, %v1394_v57 }
 0x6ce   :  { %v1246_v54 = vmul.f32 0.5, %v1230_v30  ;;  %v1450_v45 = vmul.f32 %v1398_v55, %v1242_v25 }
 0x6cf   :  { %v1468_v53 = vmul.f32 %v3158_v22, %v1449_v6 }
 0x6d0   :  { %v1262_v44 = vmul.f32 %v1246_v54, %v1246_v54  ;;  %v1469_v47 = vmul.f32 %v3158_v22, %v1450_v45 }
 0x6d1   :  { %v1487_v36 = vadd.f32 %v3174_v56, %v1468_v53 }
 0x6d2   :  { %v2017_v35 = vpop.eup %2016  ;;  %v1278_v63 = vadd.f32 1e-05, %v1262_v44  ;;  %v1176_v14 = vpop.permute.xlu0 %1175  ;;  %v1488_v17 = vadd.f32 %v3174_v56, %v1469_v47 }
 0x6d3   :  { %v1420_v9 = vmul.f32 %v2017_v35, %v1277_v50  ;;  %v3290_v28 = vpop.f32.mrf.mxu0  ;;  %v1211_v59 = vsel %vm2609_vm2, %v1128_v33, %v1176_v14  ;;  %v1178_v23 = vpop.permute.xlu1 %1177  ;;  %v1503_v46 = vadd.f32 %v1487_v36, %v2867_v3  ;;  %vm1426_vm7 = vweird.f32 %v2017_v35 }
 0x6d4   :  { %2018 = vrsqrt.f32 %v1278_v63  ;;  %v1602_v25 = vpack.c.bf16 %v3290_v28, %v3282_v41  ;;  %v1227_v52 = vsub.f32 %v3016_v42, %v1211_v59  ;;  %v1212_v18 = vsel %vm2609_vm2, %v1130_v8, %v1178_v23  ;;  %v3336_v41 = vld [vmem:[%s3624_s11] ss:$0 sm:$0xff]  ;;  %s2198_s11 = smov [#allocation8]  }
 0x6d5   :  { %v1421_v43 = vmul.f32 %v2017_v35, %v1420_v9  ;;  %v1228_v58 = vsub.f32 %v3037_v12, %v1212_v18  ;;  %v1504_v29 = vadd.f32 %v1488_v17, %v2870_v49  ;;  %vm1425_vm2 = vweird.f32 %v1277_v50  ;;  %s1892_s24 = sshll.u32 %s2198_s11, 4  ;;  %s1893_s24 = int_to_ptr.vmem [resolvable:$true] %s1892_s24 }
 0x6d6   :  { %v1243_v0 = vmul.f32 0.5, %v1227_v52  ;;  %vm1427_vm8 = vmor %vm1425_vm2, %vm1426_vm7  ;;  %vm1435_vm10 = vweird.f32 %v1278_v63 }
 0x6d7   :  { %v1422_v33 = vmul.f32 0.5, %v1421_v43  ;;  %v1244_v48 = vmul.f32 0.5, %v1228_v58  ;;  %v1514_v15 = vpack.c.bf16 %v1504_v29, %v1503_v46 }
 0x6d8   :  { %v1259_v21 = vmul.f32 %v1243_v0, %v1243_v0 }
 0x6d9   :  { %v1423_v11 = vsub.f32 1.5, %v1422_v33  ;;  %v1260_v24 = vmul.f32 %v1244_v48, %v1244_v48  ;;  %1929 = vmatmul.msk.bf16.gmra.mxu0 %vm163_vm0, %v1514_v15 }
 0x6da   :  { %v2019_v42 = vpop.eup %2018  ;;  %v1275_v20 = vadd.f32 1e-05, %v1259_v21 }
 0x6db   :  { %v1424_v39 = vmul.f32 %v2017_v35, %v1423_v11  ;;  %v1430_v61 = vmul.f32 %v2019_v42, %v1278_v63  ;;  %v1276_v3 = vadd.f32 1e-05, %v1260_v24  ;;  %v3304_v12 = vpop.f32.mrf.mxu0  ;;  %vm1436_vm9 = vweird.f32 %v2019_v42 }
 0x6dc   :  { %2020 = vrsqrt.f32 %v1275_v20  ;;  %vm1437_vm11 = vmor %vm1435_vm10, %vm1436_vm9  ;;  %vm1405_vm13 = vweird.f32 %v1275_v20 }
 0x6dd   :  { %v1428_v34 = vsel %vm1427_vm8, %v2017_v35, %v1424_v39  ;;  %v1431_v49 = vmul.f32 %v2019_v42, %v1430_v61  ;;  %2022 = vrsqrt.f32 %v1276_v3  ;;  %vm1415_vm3 = vweird.f32 %v1276_v3 }
 0x6de   :  { %v1453_v27 = vmul.f32 %v1428_v34, %v3277_v32 }
 0x6df   :  { %v1432_v5 = vmul.f32 0.5, %v1431_v49 }
 0x6e0   :  { %v1472_v60 = vmul.f32 %v3158_v22, %v1453_v27 }
 0x6e1   :  { %v1433_v26 = vsub.f32 1.5, %v1432_v5 }
 0x6e2   :  { %v2021_v40 = vpop.eup %2020  ;;  %v1491_v32 = vadd.f32 %v3174_v56, %v1472_v60 }
 0x6e3   :  { %v1434_v30 = vmul.f32 %v2019_v42, %v1433_v26  ;;  %v1400_v50 = vmul.f32 %v2021_v40, %v1275_v20  ;;  %v2023_v57 = vpop.eup %2022  ;;  %v1569_v6 = vpop.f32.mrf.mxu0  ;;  %vm1406_vm12 = vweird.f32 %v2021_v40 }
 0x6e4   :  { %v1410_v53 = vmul.f32 %v2023_v57, %v1276_v3  ;;  %v1603_v35 = vpack.c.bf16 %v1569_v6, %v3304_v12  ;;  %vm1416_vm14 = vweird.f32 %v2023_v57  ;;  %v1507_v52 = vadd.f32 %v1491_v32, %v2928_v38  ;;  %vm1407_vm15 = vmor %vm1405_vm13, %vm1406_vm12 }
 0x6e5   :  { %v1438_v55 = vsel %vm1437_vm11, %v2019_v42, %v1434_v30  ;;  %v1401_v45 = vmul.f32 %v2021_v40, %v1400_v50  ;;  %vm1417_vm1 = vmor %vm1415_vm3, %vm1416_vm14 }
 0x6e6   :  { %v1454_v44 = vmul.f32 %v1438_v55, %v1246_v54  ;;  %v1411_v14 = vmul.f32 %v2023_v57, %v1410_v53 }
 0x6e7   :  { %v1402_v47 = vmul.f32 0.5, %v1401_v45 }
 0x6e8   :  { %v1473_v36 = vmul.f32 %v3158_v22, %v1454_v44  ;;  %v1412_v63 = vmul.f32 0.5, %v1411_v14 }
 0x6e9   :  { %v1403_v9 = vsub.f32 1.5, %v1402_v47 }
 0x6ea   :  { %v1492_v59 = vadd.f32 %v3174_v56, %v1473_v36  ;;  %v1413_v8 = vsub.f32 1.5, %v1412_v63 }
 0x6eb   :  { %v1404_v23 = vmul.f32 %v2021_v40, %v1403_v9  ;;  %v1572_v43 = vpop.f32.mrf.mxu0 }
 0x6ec   :  { %v1508_v54 = vadd.f32 %v1492_v59, %v2931_v2  ;;  %v1414_v17 = vmul.f32 %v2023_v57, %v1413_v8 }
 0x6ed   :  { %v1408_v18 = vsel %vm1407_vm15, %v2021_v40, %v1404_v23 }
 0x6ee   :  { %v1451_v46 = vmul.f32 %v1408_v18, %v1243_v0  ;;  %v1516_v58 = vpack.c.bf16 %v1508_v54, %v1507_v52  ;;  %v1418_v33 = vsel %vm1417_vm1, %v2023_v57, %v1414_v17 }
 0x6ef   :  { %v1452_v21 = vmul.f32 %v1418_v33, %v1244_v48 }
 0x6f0   :  { %v1470_v29 = vmul.f32 %v3158_v22, %v1451_v46  ;;  %1931 = vmatmul.msk.bf16.vlgmr.msra.gmra.mxu1 %vm163_vm0, %v1516_v58 }
 0x6f1   :  { %v1471_v11 = vmul.f32 %v3158_v22, %v1452_v21 }
 0x6f2   :  { %v1489_v38 = vadd.f32 %v3174_v56, %v1470_v29 }
 0x6f3   :  { %v1574_v15 = vpop.f32.mrf.mxu0  ;;  %v1490_v2 = vadd.f32 %v3174_v56, %v1471_v11 }
 0x6f4   :  { %v1505_v42 = vadd.f32 %v1489_v38, %v2909_v37  ;;  %v1604_v20 = vpack.c.bf16 %v1574_v15, %v1572_v43 }
 0x6f5   :  { %v1506_v0 = vadd.f32 %v1490_v2, %v2912_v51 }
 0x6f7   :  { %v1515_v24 = vpack.c.bf16 %v1506_v0, %v1505_v42 }
 0x6f9   :  { %1930 = vmatmul.msk.bf16.gmra.mxu0 %vm163_vm0, %v1515_v24  ;;  %vm1663_vm0 = vcmp.lt.s32.totalorder %v2601_v31, 8 }
 0x6fb   :  { %v1577_v39 = vpop.f32.mrf.mxu0 }
 0x703   :  { %v1579_v61 = vpop.f32.mrf.mxu0 }
 0x704   :  { %v1605_v40 = vpack.c.bf16 %v1579_v61, %v1577_v39 }
 0x745   :  { %v1582_v48 = vpop.f32.mrf.mxu0 }
 0x74d   :  { %v1584_v3 = vpop.f32.mrf.mxu0 }
 0x74e   :  { %v1606_v51 = vpack.c.bf16 %v1584_v3, %v1582_v48 }
 0x756   :  { %v1587_v12 = vpop.f32.mrf.mxu0 }
 0x75e   :  { %v1589_v22 = vpop.f32.mrf.mxu0 }
 0x75f   :  { %v1607_v37 = vpack.c.bf16 %v1589_v22, %v1587_v12 }
 0x76d   :  { %v1597_v34 = vpop.f32.mrf.mxu1 }
 0x775   :  { %v1599_v49 = vpop.f32.mrf.mxu1 }
 0x776   :  { %v1609_v5 = vpack.c.bf16 %v1599_v49, %v1597_v34  ;;  %v1592_v27 = vpop.f32.mrf.mxu0 }
 0x778   :  { %1614 = vmatpush.bf16.msrb.mxu2 %v1609_v5 }
 0x77e   :  { %v1594_v56 = vpop.f32.mrf.mxu0 }
 0x77f   :  { %v1608_v26 = vpack.c.bf16 %v1594_v56, %v1592_v27 }
 0x781   :  { %1615 = vmatpush.bf16.msrb.mxu2 %v1608_v26 }
 0x785   :  { %1616 = vmatpush.bf16.msrb.mxu2 %v1607_v37 }
 0x789   :  { %1617 = vmatpush.bf16.msrb.mxu2 %v1606_v51 }
 0x78d   :  { %1618 = vmatpush.bf16.msrb.mxu2 %v1605_v40 }
 0x791   :  { %1619 = vmatpush.bf16.msrb.mxu2 %v1604_v20 }
 0x795   :  { %1620 = vmatpush.bf16.msrb.mxu2 %v1603_v35 }
 0x799   :  { %1621 = vmatpush.bf16.msrb.mxu2 %v1602_v25 }
 0x79c   :  { %1622 = vmatmul.bf16.vlgmr.msrb.gmra.mxu2 %v2365_v62 }
 0x7ac   :  { %1627 = vmatmul.bf16.gmra.mxu2 %v2374_v1 }
 0x7bc   :  { %1632 = vmatmul.bf16.gmra.mxu2 %v2383_v4 }
 0x7cc   :  { %1637 = vmatmul.bf16.gmra.mxu2 %v2392_v7 }
 0x7dc   :  { %1642 = vmatmul.bf16.gmra.mxu2 %v2401_v10 }
 0x7ec   :  { %1647 = vmatmul.bf16.gmra.mxu2 %v2410_v13 }
 0x7fc   :  { %1652 = vmatmul.bf16.gmra.mxu2 %v2419_v16 }
 0x80c   :  { %1657 = vmatmul.bf16.gmra.mxu2 %v2428_v19 }
 0x81f   :  { %v1623_v62 = vpop.f32.mrf.mxu2 }
 0x820   :  { %v3340_v1 = vadd.f32 %v3336_v41, %v1623_v62 }
 0x822   :  { %v1664_v4 = vsel %vm1663_vm0, %v3340_v1, -1e+30 }
 0x823   :  { %1680 = vmax.xlane.f32.xlu2 %v1664_v4 }
 0x827   :  { %v1625_v7 = vpop.f32.mrf.mxu2 }
 0x828   :  { %v3346_v10 = vadd.f32 %v3336_v41, %v1625_v7 }
 0x82a   :  { %v3351_v13 = vsel %vm1663_vm0, %v3346_v10, -1e+30 }
 0x82b   :  { %1682 = vmax.xlane.f32.xlu0 %v3351_v13 }
 0x82f   :  { %v1628_v16 = vpop.f32.mrf.mxu2 }
 0x830   :  { %v3355_v19 = vadd.f32 %v3336_v41, %v1628_v16 }
 0x832   :  { %v3360_v28 = vsel %vm1663_vm0, %v3355_v19, -1e+30 }
 0x833   :  { %1684 = vmax.xlane.f32.xlu1 %v3360_v28 }
 0x837   :  { %v1630_v25 = vpop.f32.mrf.mxu2 }
 0x838   :  { %v3364_v30 = vadd.f32 %v3336_v41, %v1630_v25 }
 0x83a   :  { %v3369_v50 = vsel %vm1663_vm0, %v3364_v30, -1e+30 }
 0x83b   :  { %1686 = vmax.xlane.f32.xlu2 %v3369_v50 }
 0x83f   :  { %v1633_v57 = vpop.f32.mrf.mxu2 }
 0x840   :  { %v3373_v60 = vadd.f32 %v3336_v41, %v1633_v57 }
 0x842   :  { %v3378_v6 = vsel %vm1663_vm0, %v3373_v60, -1e+30 }
 0x843   :  { %1688 = vmax.xlane.f32.xlu2 %v3378_v6 }
 0x847   :  { %v1635_v55 = vpop.f32.mrf.mxu2 }
 0x848   :  { %v3382_v45 = vadd.f32 %v3336_v41, %v1635_v55 }
 0x84a   :  { %v3387_v53 = vsel %vm1663_vm0, %v3382_v45, -1e+30 }
 0x84b   :  { %1690 = vmax.xlane.f32.xlu0 %v3387_v53 }
 0x84f   :  { %v1638_v44 = vpop.f32.mrf.mxu2 }
 0x850   :  { %v3391_v35 = vadd.f32 %v3336_v41, %v1638_v44 }
 0x852   :  { %v3396_v47 = vsel %vm1663_vm0, %v3391_v35, -1e+30 }
 0x853   :  { %1692 = vmax.xlane.f32.xlu1 %v3396_v47 }
 0x857   :  { %v1640_v14 = vpop.f32.mrf.mxu2 }
 0x858   :  { %v3400_v32 = vadd.f32 %v3336_v41, %v1640_v14 }
 0x85a   :  { %v3405_v36 = vsel %vm1663_vm0, %v3400_v32, -1e+30 }
 0x85b   :  { %1694 = vmax.xlane.f32.xlu2 %v3405_v36 }
 0x85f   :  { %v1643_v9 = vpop.f32.mrf.mxu2 }
 0x860   :  { %v3409_v63 = vadd.f32 %v3336_v41, %v1643_v9 }
 0x862   :  { %v3414_v59 = vsel %vm1663_vm0, %v3409_v63, -1e+30 }
 0x863   :  { %1696 = vmax.xlane.f32.xlu0 %v3414_v59 }
 0x867   :  { %v1645_v23 = vpop.f32.mrf.mxu2 }
 0x868   :  { %v3418_v8 = vadd.f32 %v3336_v41, %v1645_v23 }
 0x86a   :  { %v3423_v52 = vsel %vm1663_vm0, %v3418_v8, -1e+30 }
 0x86b   :  { %1698 = vmax.xlane.f32.xlu1 %v3423_v52 }
 0x86f   :  { %v1648_v54 = vpop.f32.mrf.mxu2 }
 0x870   :  { %v3427_v43 = vadd.f32 %v3336_v41, %v1648_v54 }
 0x872   :  { %v3432_v18 = vsel %vm1663_vm0, %v3427_v43, -1e+30 }
 0x873   :  { %1700 = vmax.xlane.f32.xlu2 %v3432_v18 }
 0x877   :  { %v1650_v17 = vpop.f32.mrf.mxu2 }
 0x878   :  { %v3436_v46 = vadd.f32 %v3336_v41, %v1650_v17 }
 0x87a   :  { %v3441_v58 = vsel %vm1663_vm0, %v3436_v46, -1e+30 }
 0x87b   :  { %1702 = vmax.xlane.f32.xlu0 %v3441_v58 }
 0x87f   :  { %v1653_v33 = vpop.f32.mrf.mxu2 }
 0x880   :  { %v3445_v29 = vadd.f32 %v3336_v41, %v1653_v33 }
 0x882   :  { %v3450_v21 = vsel %vm1663_vm0, %v3445_v29, -1e+30 }
 0x883   :  { %1704 = vmax.xlane.f32.xlu1 %v3450_v21 }
 0x887   :  { %v1655_v11 = vpop.f32.mrf.mxu2 }
 0x888   :  { %v3454_v38 = vadd.f32 %v3336_v41, %v1655_v11 }
 0x88a   :  { %v3459_v15 = vsel %vm1663_vm0, %v3454_v38, -1e+30 }
 0x88b   :  { %1706 = vmax.xlane.f32.xlu2 %v3459_v15 }
 0x88f   :  { %v1658_v2 = vpop.f32.mrf.mxu2 }
 0x890   :  { %v3463_v42 = vadd.f32 %v3336_v41, %v1658_v2 }
 0x892   :  { %v3468_v20 = vsel %vm1663_vm0, %v3463_v42, -1e+30 }
 0x893   :  { %1708 = vmax.xlane.f32.xlu0 %v3468_v20 }
 0x896   :  { %v3471_v0 = vpop.xlane.xlu2 %1680 }
 0x897   :  { %v1712_v24 = vsub.f32 %v1664_v4, %v3471_v0  ;;  %v1660_v39 = vpop.f32.mrf.mxu2 }
 0x898   :  { %v3475_v61 = vadd.f32 %v3336_v41, %v1660_v39 }
 0x899   :  { %v1728_v48 = vmul.f32 1.442695, %v1712_v24 }
 0x89a   :  { %v3480_v3 = vsel %vm1663_vm0, %v3475_v61, -1e+30 }
 0x89b   :  { %2024 = vpow2.f32 %v1728_v48  ;;  %1710 = vmax.xlane.f32.xlu1 %v3480_v3 }
 0x89e   :  { %v3483_v12 = vpop.xlane.xlu0 %1682 }
 0x89f   :  { %v1713_v34 = vsub.f32 %v3351_v13, %v3483_v12 }
 0x8a1   :  { %v2025_v22 = vpop.eup %2024  ;;  %v1730_v49 = vmul.f32 1.442695, %v1713_v34 }
 0x8a2   :  { %v1760_v5 = vsel %vm1663_vm0, %v2025_v22, 0.0 }
 0x8a3   :  { %2026 = vpow2.f32 %v1730_v49  ;;  %1776 = vadd.xlane.f32.xlu2 %v1760_v5 }
 0x8a6   :  { %v3489_v27 = vpop.xlane.xlu1 %1684 }
 0x8a7   :  { %v1714_v56 = vsub.f32 %v3360_v28, %v3489_v27 }
 0x8a9   :  { %v2027_v26 = vpop.eup %2026  ;;  %v1732_v37 = vmul.f32 1.442695, %v1714_v56 }
 0x8aa   :  { %v1761_v51 = vsel %vm1663_vm0, %v2027_v26, 0.0 }
 0x8ab   :  { %2028 = vpow2.f32 %v1732_v37  ;;  %1778 = vadd.xlane.f32.xlu0 %v1761_v51 }
 0x8ae   :  { %v3495_v40 = vpop.xlane.xlu2 %1686 }
 0x8af   :  { %v1715_v41 = vsub.f32 %v3369_v50, %v3495_v40 }
 0x8b1   :  { %v2029_v62 = vpop.eup %2028  ;;  %v1734_v4 = vmul.f32 1.442695, %v1715_v41 }
 0x8b2   :  { %v1762_v7 = vsel %vm1663_vm0, %v2029_v62, 0.0 }
 0x8b3   :  { %2030 = vpow2.f32 %v1734_v4  ;;  %1780 = vadd.xlane.f32.xlu1 %v1762_v7 }
 0x8b6   :  { %v3501_v13 = vpop.xlane.xlu2 %1688 }
 0x8b7   :  { %v1716_v16 = vsub.f32 %v3378_v6, %v3501_v13 }
 0x8b9   :  { %v2031_v28 = vpop.eup %2030  ;;  %v1736_v25 = vmul.f32 1.442695, %v1716_v16 }
 0x8ba   :  { %v1763_v57 = vsel %vm1663_vm0, %v2031_v28, 0.0 }
 0x8bb   :  { %2032 = vpow2.f32 %v1736_v25  ;;  %1782 = vadd.xlane.f32.xlu2 %v1763_v57 }
 0x8be   :  { %v3507_v50 = vpop.xlane.xlu0 %1690 }
 0x8bf   :  { %v1717_v55 = vsub.f32 %v3387_v53, %v3507_v50 }
 0x8c1   :  { %v2033_v44 = vpop.eup %2032  ;;  %v1738_v14 = vmul.f32 1.442695, %v1717_v55 }
 0x8c2   :  { %v1764_v9 = vsel %vm1663_vm0, %v2033_v44, 0.0 }
 0x8c3   :  { %2034 = vpow2.f32 %v1738_v14  ;;  %1784 = vadd.xlane.f32.xlu0 %v1764_v9 }
 0x8c6   :  { %v3513_v6 = vpop.xlane.xlu1 %1692 }
 0x8c7   :  { %v1718_v23 = vsub.f32 %v3396_v47, %v3513_v6 }
 0x8c9   :  { %v2035_v54 = vpop.eup %2034  ;;  %v1740_v17 = vmul.f32 1.442695, %v1718_v23 }
 0x8ca   :  { %v1765_v33 = vsel %vm1663_vm0, %v2035_v54, 0.0 }
 0x8cb   :  { %2036 = vpow2.f32 %v1740_v17  ;;  %1786 = vadd.xlane.f32.xlu1 %v1765_v33 }
 0x8ce   :  { %v3519_v53 = vpop.xlane.xlu2 %1694 }
 0x8cf   :  { %v1719_v11 = vsub.f32 %v3405_v36, %v3519_v53 }
 0x8d1   :  { %v2037_v2 = vpop.eup %2036  ;;  %v1742_v24 = vmul.f32 1.442695, %v1719_v11 }
 0x8d2   :  { %v1766_v39 = vsel %vm1663_vm0, %v2037_v2, 0.0 }
 0x8d3   :  { %2038 = vpow2.f32 %v1742_v24  ;;  %1788 = vadd.xlane.f32.xlu2 %v1766_v39 }
 0x8d6   :  { %v3525_v47 = vpop.xlane.xlu0 %1696 }
 0x8d7   :  { %v1720_v48 = vsub.f32 %v3414_v59, %v3525_v47 }
 0x8d9   :  { %v2039_v34 = vpop.eup %2038  ;;  %v1744_v22 = vmul.f32 1.442695, %v1720_v48 }
 0x8da   :  { %v1767_v49 = vsel %vm1663_vm0, %v2039_v34, 0.0 }
 0x8db   :  { %2040 = vpow2.f32 %v1744_v22  ;;  %1790 = vadd.xlane.f32.xlu0 %v1767_v49 }
 0x8de   :  { %v3531_v36 = vpop.xlane.xlu1 %1698 }
 0x8df   :  { %v1721_v5 = vsub.f32 %v3423_v52, %v3531_v36 }
 0x8e1   :  { %v2041_v56 = vpop.eup %2040  ;;  %v1746_v26 = vmul.f32 1.442695, %v1721_v5 }
 0x8e2   :  { %v1768_v37 = vsel %vm1663_vm0, %v2041_v56, 0.0 }
 0x8e3   :  { %2042 = vpow2.f32 %v1746_v26  ;;  %1792 = vadd.xlane.f32.xlu1 %v1768_v37 }
 0x8e6   :  { %v3537_v59 = vpop.xlane.xlu2 %1700 }
 0x8e7   :  { %v1722_v51 = vsub.f32 %v3432_v18, %v3537_v59 }
 0x8e9   :  { %v2043_v41 = vpop.eup %2042  ;;  %v1748_v62 = vmul.f32 1.442695, %v1722_v51 }
 0x8ea   :  { %v1769_v4 = vsel %vm1663_vm0, %v2043_v41, 0.0 }
 0x8eb   :  { %2044 = vpow2.f32 %v1748_v62  ;;  %1794 = vadd.xlane.f32.xlu2 %v1769_v4 }
 0x8ee   :  { %v3543_v52 = vpop.xlane.xlu0 %1702 }
 0x8ef   :  { %v1723_v7 = vsub.f32 %v3441_v58, %v3543_v52 }
 0x8f1   :  { %v2045_v16 = vpop.eup %2044  ;;  %v1750_v28 = vmul.f32 1.442695, %v1723_v7 }
 0x8f2   :  { %v1770_v25 = vsel %vm1663_vm0, %v2045_v16, 0.0 }
 0x8f3   :  { %2046 = vpow2.f32 %v1750_v28  ;;  %1796 = vadd.xlane.f32.xlu0 %v1770_v25 }
 0x8f6   :  { %v3549_v18 = vpop.xlane.xlu1 %1704 }
 0x8f7   :  { %v1724_v57 = vsub.f32 %v3450_v21, %v3549_v18 }
 0x8f9   :  { %v2047_v55 = vpop.eup %2046  ;;  %v1752_v44 = vmul.f32 1.442695, %v1724_v57 }
 0x8fa   :  { %v1771_v14 = vsel %vm1663_vm0, %v2047_v55, 0.0 }
 0x8fb   :  { %2048 = vpow2.f32 %v1752_v44  ;;  %1798 = vadd.xlane.f32.xlu1 %v1771_v14 }
 0x8fe   :  { %v3555_v58 = vpop.xlane.xlu2 %1706 }
 0x8ff   :  { %v1725_v9 = vsub.f32 %v3459_v15, %v3555_v58 }
 0x901   :  { %v2049_v23 = vpop.eup %2048  ;;  %v1754_v54 = vmul.f32 1.442695, %v1725_v9 }
 0x902   :  { %v1772_v17 = vsel %vm1663_vm0, %v2049_v23, 0.0 }
 0x903   :  { %2050 = vpow2.f32 %v1754_v54  ;;  %1800 = vadd.xlane.f32.xlu2 %v1772_v17 }
 0x906   :  { %v3561_v21 = vpop.xlane.xlu0 %1708 }
 0x907   :  { %v1726_v33 = vsub.f32 %v3468_v20, %v3561_v21 }
 0x909   :  { %v2051_v11 = vpop.eup %2050  ;;  %v1756_v2 = vmul.f32 1.442695, %v1726_v33 }
 0x90a   :  { %v1773_v24 = vsel %vm1663_vm0, %v2051_v11, 0.0 }
 0x90b   :  { %2052 = vpow2.f32 %v1756_v2  ;;  %1802 = vadd.xlane.f32.xlu0 %v1773_v24 }
 0x90e   :  { %v3567_v15 = vpop.xlane.xlu1 %1710 }
 0x90f   :  { %v1727_v39 = vsub.f32 %v3480_v3, %v3567_v15 }
 0x911   :  { %v2053_v48 = vpop.eup %2052  ;;  %v1758_v34 = vmul.f32 1.442695, %v1727_v39 }
 0x912   :  { %v1774_v22 = vsel %vm1663_vm0, %v2053_v48, 0.0 }
 0x913   :  { %2054 = vpow2.f32 %v1758_v34  ;;  %1804 = vadd.xlane.f32.xlu1 %v1774_v22 }
 0x916   :  { %v1777_v20 = vpop.xlane.xlu2 %1776 }
 0x917   :  { %2056 = vlog2.f32 %v1777_v20 }
 0x919   :  { %v2055_v49 = vpop.eup %2054 }
 0x91a   :  { %v1775_v5 = vsel %vm1663_vm0, %v2055_v49, 0.0 }
 0x91b   :  { %1806 = vadd.xlane.f32.xlu2 %v1775_v5 }
 0x91d   :  { %v2057_v56 = vpop.eup %2056 }
 0x91e   :  { %v1809_v26 = vmul.f32 0.6931472, %v2057_v56  ;;  %v1779_v37 = vpop.xlane.xlu0 %1778 }
 0x91f   :  { %2058 = vlog2.f32 %v1779_v37 }
 0x920   :  { %v1840_v3 = vadd.f32 %v1809_v26, %v3471_v0 }
 0x922   :  { %v1856_v51 = vsub.f32 %v3340_v1, %v1840_v3 }
 0x924   :  { %1872 = vst [vmem:[#allocation8] sm:$0xff] %v1856_v51 }
 0x925   :  { %v2059_v41 = vpop.eup %2058 }
 0x926   :  { %v1811_v62 = vmul.f32 0.6931472, %v2059_v41  ;;  %v1781_v4 = vpop.xlane.xlu1 %1780 }
 0x927   :  { %2060 = vlog2.f32 %v1781_v4 }
 0x928   :  { %v1841_v7 = vadd.f32 %v1811_v62, %v3483_v12 }
 0x92a   :  { %v1857_v16 = vsub.f32 %v3346_v10, %v1841_v7 }
 0x92c   :  { %1873 = vst [vmem:[#allocation8 + $0x8] sm:$0xff] %v1857_v16 }
 0x92d   :  { %v2061_v31 = vpop.eup %2060 }
 0x92e   :  { %v1813_v28 = vmul.f32 0.6931472, %v2061_v31  ;;  %v1783_v25 = vpop.xlane.xlu2 %1782 }
 0x92f   :  { %2062 = vlog2.f32 %v1783_v25 }
 0x930   :  { %v1842_v57 = vadd.f32 %v1813_v28, %v3489_v27 }
 0x932   :  { %v1858_v0 = vsub.f32 %v3355_v19, %v1842_v57 }
 0x934   :  { %1874 = vst [vmem:[#allocation8 + $0x10] sm:$0xff] %v1858_v0 }
 0x935   :  { %v2063_v1 = vpop.eup %2062 }
 0x936   :  { %v1815_v55 = vmul.f32 0.6931472, %v2063_v1  ;;  %v1785_v44 = vpop.xlane.xlu0 %1784 }
 0x937   :  { %2064 = vlog2.f32 %v1785_v44 }
 0x938   :  { %v1843_v14 = vadd.f32 %v1815_v55, %v3495_v40 }
 0x93a   :  { %v1859_v12 = vsub.f32 %v3364_v30, %v1843_v14 }
 0x93c   :  { %1875 = vst [vmem:[#allocation8 + $0x18] sm:$0xff] %v1859_v12 }
 0x93d   :  { %v2065_v10 = vpop.eup %2064 }
 0x93e   :  { %v1817_v9 = vmul.f32 0.6931472, %v2065_v10  ;;  %v1787_v23 = vpop.xlane.xlu1 %1786 }
 0x93f   :  { %2066 = vlog2.f32 %v1787_v23 }
 0x940   :  { %v1844_v54 = vadd.f32 %v1817_v9, %v3501_v13 }
 0x942   :  { %v1860_v27 = vsub.f32 %v3373_v60, %v1844_v54 }
 0x944   :  { %1876 = vst [vmem:[#allocation8 + $0x20] sm:$0xff] %v1860_v27 }
 0x945   :  { %v2067_v19 = vpop.eup %2066 }
 0x946   :  { %v1819_v17 = vmul.f32 0.6931472, %v2067_v19  ;;  %v1789_v33 = vpop.xlane.xlu2 %1788 }
 0x947   :  { %2068 = vlog2.f32 %v1789_v33 }
 0x948   :  { %v1845_v11 = vadd.f32 %v1819_v17, %v3507_v50 }
 0x94a   :  { %v1861_v40 = vsub.f32 %v3382_v45, %v1845_v11 }
 0x94c   :  { %1877 = vst [vmem:[#allocation8 + $0x28] sm:$0xff] %v1861_v40 }
 0x94d   :  { %v2069_v30 = vpop.eup %2068 }
 0x94e   :  { %v1821_v2 = vmul.f32 0.6931472, %v2069_v30  ;;  %v1791_v24 = vpop.xlane.xlu0 %1790 }
 0x94f   :  { %2070 = vlog2.f32 %v1791_v24 }
 0x950   :  { %v1846_v39 = vadd.f32 %v1821_v2, %v3513_v6 }
 0x952   :  { %v1862_v13 = vsub.f32 %v3391_v35, %v1846_v39 }
 0x954   :  { %1878 = vst [vmem:[#allocation8 + $0x30] sm:$0xff] %v1862_v13 }
 0x955   :  { %v2071_v60 = vpop.eup %2070 }
 0x956   :  { %v1823_v48 = vmul.f32 0.6931472, %v2071_v60  ;;  %v1793_v34 = vpop.xlane.xlu1 %1792 }
 0x957   :  { %2072 = vlog2.f32 %v1793_v34 }
 0x958   :  { %v1847_v22 = vadd.f32 %v1823_v48, %v3519_v53 }
 0x95a   :  { %v1863_v50 = vsub.f32 %v3400_v32, %v1847_v22 }
 0x95c   :  { %1879 = vst [vmem:[#allocation8 + $0x38] sm:$0xff] %v1863_v50 }
 0x95d   :  { %v2073_v45 = vpop.eup %2072 }
 0x95e   :  { %v1825_v20 = vmul.f32 0.6931472, %v2073_v45  ;;  %v1795_v49 = vpop.xlane.xlu2 %1794 }
 0x95f   :  { %2074 = vlog2.f32 %v1795_v49 }
 0x960   :  { %v1848_v5 = vadd.f32 %v1825_v20, %v3525_v47 }
 0x962   :  { %v1864_v6 = vsub.f32 %v3409_v63, %v1848_v5 }
 0x964   :  { %1880 = vst [vmem:[#allocation8 + $0x40] sm:$0xff] %v1864_v6 }
 0x965   :  { %v2075_v35 = vpop.eup %2074 }
 0x966   :  { %v1827_v56 = vmul.f32 0.6931472, %v2075_v35  ;;  %v1797_v26 = vpop.xlane.xlu0 %1796 }
 0x967   :  { %2076 = vlog2.f32 %v1797_v26 }
 0x968   :  { %v1849_v37 = vadd.f32 %v1827_v56, %v3531_v36 }
 0x96a   :  { %v1865_v53 = vsub.f32 %v3418_v8, %v1849_v37 }
 0x96c   :  { %1881 = vst [vmem:[#allocation8 + $0x48] sm:$0xff] %v1865_v53 }
 0x96d   :  { %v2077_v32 = vpop.eup %2076 }
 0x96e   :  { %v1829_v3 = vmul.f32 0.6931472, %v2077_v32  ;;  %v1799_v51 = vpop.xlane.xlu1 %1798 }
 0x96f   :  { %2078 = vlog2.f32 %v1799_v51 }
 0x970   :  { %v1850_v41 = vadd.f32 %v1829_v3, %v3537_v59 }
 0x972   :  { %v1866_v47 = vsub.f32 %v3427_v43, %v1850_v41 }
 0x974   :  { %1882 = vst [vmem:[#allocation8 + $0x50] sm:$0xff] %v1866_v47 }
 0x975   :  { %v2079_v63 = vpop.eup %2078 }
 0x976   :  { %v1831_v62 = vmul.f32 0.6931472, %v2079_v63  ;;  %v1801_v4 = vpop.xlane.xlu2 %1800 }
 0x977   :  { %2080 = vlog2.f32 %v1801_v4 }
 0x978   :  { %v1851_v7 = vadd.f32 %v1831_v62, %v3543_v52 }
 0x97a   :  { %v1867_v36 = vsub.f32 %v3436_v46, %v1851_v7 }
 0x97c   :  { %1883 = vst [vmem:[#allocation8 + $0x58] sm:$0xff] %v1867_v36 }
 0x97d   :  { %v2081_v8 = vpop.eup %2080 }
 0x97e   :  { %v1833_v16 = vmul.f32 0.6931472, %v2081_v8  ;;  %v1803_v31 = vpop.xlane.xlu0 %1802 }
 0x97f   :  { %2082 = vlog2.f32 %v1803_v31 }
 0x980   :  { %v1852_v28 = vadd.f32 %v1833_v16, %v3549_v18 }
 0x982   :  { %v1868_v59 = vsub.f32 %v3445_v29, %v1852_v28 }
 0x984   :  { %1884 = vst [vmem:[#allocation8 + $0x60] sm:$0xff] %v1868_v59 }
 0x985   :  { %v2083_v43 = vpop.eup %2082 }
 0x986   :  { %v1835_v25 = vmul.f32 0.6931472, %v2083_v43  ;;  %v1805_v57 = vpop.xlane.xlu1 %1804 }
 0x987   :  { %2084 = vlog2.f32 %v1805_v57 }
 0x988   :  { %v1853_v0 = vadd.f32 %v1835_v25, %v3555_v58 }
 0x98a   :  { %v1869_v52 = vsub.f32 %v3454_v38, %v1853_v0 }
 0x98c   :  { %1885 = vst [vmem:[#allocation8 + $0x68] sm:$0xff] %v1869_v52 }
 0x98d   :  { %v2085_v46 = vpop.eup %2084 }
 0x98e   :  { %v1837_v1 = vmul.f32 0.6931472, %v2085_v46  ;;  %v1807_v55 = vpop.xlane.xlu2 %1806 }
 0x98f   :  { %2086 = vlog2.f32 %v1807_v55 }
 0x990   :  { %v1854_v44 = vadd.f32 %v1837_v1, %v3561_v21 }
 0x992   :  { %v1870_v18 = vsub.f32 %v3463_v42, %v1854_v44 }
 0x994   :  { %1886 = vst [vmem:[#allocation8 + $0x70] sm:$0xff] %v1870_v18 }
 0x995   :  { %v2087_v29 = vpop.eup %2086 }
 0x996   :  { %v1839_v14 = vmul.f32 0.6931472, %v2087_v29 }
 0x998   :  { %v1855_v38 = vadd.f32 %v1839_v14, %v3567_v15 }
 0x99a   :  { %v1871_v58 = vsub.f32 %v3475_v61, %v1855_v38 }
 0x99c   :  { %1887 = vst [vmem:[#allocation8 + $0x78] sm:$0xff] %v1871_v58 }
 0x99d   :  { %1900 = dma.vmem_to_hbm [thread:$0]  %s1893_s24, 2048, %s1895_s26, [#allocation4], %s2191_s29, %s2191_s29, %s2192_s30  }
 0x99e   :  { %2188 = dma.done.wait [#allocation4], 2048  }
 0x99f   :  { %2189 = vsyncadd [#allocation4], 4294965248 }
 0x9a0   :  { %1905 = vsyncpa [#allocation3], 1 }
 0x9a1   :  { %1906 = vsyncpa [#allocation6], 1 }
 0x9a2   :  { %1907 = vsyncpa [#allocation4], 1 }

</bundles_post_ra>
